<compile_context>
chip_gen: v6e
topology: v6e:2x2x1
jax: 0.10.0
libtpu: 0.0.40
codegen_flags: <defaults>
</compile_context>

<pallas_src>
import functools

import jax
import jax.numpy as jnp
from jax import lax
from jax.experimental import pallas as pl
from jax.experimental.pallas import tpu as pltpu


# ----------------------------------------------------------------------------
# Fused kernel: one batch element per grid step, channels-first (C, T) layout.
# ----------------------------------------------------------------------------
def _wavenet_kernel(dilations,
                    x_ref, wf0_ref, wf1_ref, wg0_ref, wg1_ref,
                    ws_ref, wr_ref, br_ref, bsum_ref,
                    w1_ref, b1_ref, w2_ref, b2_ref, out_ref):
    f32, bf16 = jnp.float32, jnp.bfloat16

    x = x_ref[...]                                           # (C, T) f32, NCL
    skip = jnp.zeros((ws_ref.shape[1], x.shape[1]), f32)     # (S, T) f32 accumulator

    # Static unroll over the residual blocks (dilations are Python ints); the
    # live state (x: 1 vreg, skip: 2 vregs) is tiny at these channel counts.
    for i, d in enumerate(dilations):
        x_bf = x.astype(bf16)
        # x[:, t-d] via a lane roll (XLU); wrapped columns t < d are in the
        # invalid region and never feed a valid output.
        xp_bf = pltpu.roll(x, shift=d, axis=1).astype(bf16)

        f_pre = (jnp.dot(wf0_ref[i], xp_bf, preferred_element_type=f32)
                 + jnp.dot(wf1_ref[i], x_bf, preferred_element_type=f32))
        g_pre = (jnp.dot(wg0_ref[i], xp_bf, preferred_element_type=f32)
                 + jnp.dot(wg1_ref[i], x_bf, preferred_element_type=f32))
        z = jnp.tanh(f_pre) * jax.nn.sigmoid(g_pre)          # (C, T) f32
        z_bf = z.astype(bf16)

        # Skip 1x1 conv (bias folded into bsum, added once after the loop).
        skip = skip + jnp.dot(ws_ref[i], z_bf, preferred_element_type=f32)
        # Residual 1x1 conv + residual add (same absolute time column).
        x = jnp.dot(wr_ref[i], z_bf, preferred_element_type=f32) + br_ref[i] + x

    # Post network: ReLU -> 1x1 -> ReLU -> 1x1, row-oriented so the final
    # store is a lane-dense (T, 128) slab.
    s = jnp.maximum(skip.T + bsum_ref[...], 0.0)             # (T, S)
    h = jnp.maximum(
        jnp.dot(s.astype(bf16), w1_ref[...], preferred_element_type=f32)
        + b1_ref[...], 0.0)                                  # (T, S)
    out_ref[...] = (jnp.dot(h.astype(bf16), w2_ref[...], preferred_element_type=f32)
                    + b2_ref[...])                           # (T, D_pad)


def _pack_params(params, d_pad):
    """Pack / transpose weights once outside the kernel (channels-first
    in-kernel layout); GEMM operands are cast to bf16, biases stay f32."""
    bf16 = jnp.bfloat16
    blocks = params['blocks']
    wf0 = jnp.stack([p['wf0'].T for p in blocks]).astype(bf16)   # (nb, C, C)
    wf1 = jnp.stack([p['wf1'].T for p in blocks]).astype(bf16)   # (nb, C, C)
    wg0 = jnp.stack([p['wg0'].T for p in blocks]).astype(bf16)   # (nb, C, C)
    wg1 = jnp.stack([p['wg1'].T for p in blocks]).astype(bf16)   # (nb, C, C)
    ws = jnp.stack([p['ws'].T for p in blocks]).astype(bf16)     # (nb, S, C)
    wr = jnp.stack([p['wr'].T for p in blocks]).astype(bf16)     # (nb, C, C)
    br = jnp.stack([p['br'].T for p in blocks])                  # (nb, C, 1) f32
    bs_sum = sum(p['bs'] for p in blocks)                        # (1, S) f32
    post = params['post']
    d = post['w2'].shape[-1]
    w1 = post['w1'].astype(bf16)                                 # (S, S)
    b1 = post['b1']                                              # (1, S) f32
    w2 = jnp.pad(post['w2'], ((0, 0), (0, d_pad - d))).astype(bf16)  # (S, d_pad)
    b2 = jnp.pad(post['b2'], ((0, 0), (0, d_pad - d)))               # (1, d_pad) f32
    return wf0, wf1, wg0, wg1, ws, wr, br, bs_sum, w1, b1, w2, b2


@functools.partial(jax.jit, static_argnums=(2,))
def wavenet_forward(tokens, params, dilations):
    # nn.Embedding lookup (gather) + NCL transpose — plain-JAX glue outside the
    # kernel.  TODO(synk): fuse the gather in-kernel via PrefetchScalarGridSpec
    # at production sizes.
    emb = jnp.take(params['embedding'], tokens, axis=0)          # (B, T, C)
    x = jnp.transpose(emb, (0, 2, 1))                            # (B, C, T)  NCL
    B, C, T = x.shape
    S = params['post']['w1'].shape[0]
    D = params['post']['w2'].shape[-1]
    D_pad = ((D + 127) // 128) * 128                             # lane-dense store
    nb = len(dilations)
    l_final = T - sum(dilations)

    packed = _pack_params(params, D_pad)

    def const_spec(arr):
        # Whole array resident in VMEM, same block for every grid step.
        return pl.BlockSpec(arr.shape, lambda b, _n=arr.ndim: (0,) * _n)

    in_specs = ([pl.BlockSpec((None, C, T), lambda b: (b, 0, 0))]
                + [const_spec(w) for w in packed])
    out_specs = pl.BlockSpec((None, T, D_pad), lambda b: (b, 0, 0))

    flops = 2 * B * T * (nb * (5 * C * C + C * S) + S * S + S * D_pad)
    transcendentals = 2 * B * T * C * nb
    bytes_accessed = (int(x.size) * 4 + B * T * D_pad * 4
                      + sum(int(w.size) * w.dtype.itemsize for w in packed))

    out = pl.pallas_call(
        functools.partial(_wavenet_kernel, tuple(dilations)),
        grid=(B,),
        in_specs=in_specs,
        out_specs=out_specs,
        out_shape=jax.ShapeDtypeStruct((B, T, D_pad), jnp.float32),
        compiler_params=pltpu.CompilerParams(dimension_semantics=("parallel",)),
        cost_estimate=pl.CostEstimate(flops=flops,
                                      transcendentals=transcendentals,
                                      bytes_accessed=bytes_accessed),
    )(x, *packed)

    # Only the last l_final timesteps / first D lanes are valid.
    logits = out[:, T - l_final:, :D]                            # (B, l_final, D)
    return jnp.transpose(logits, (0, 2, 1))                      # (B, in_depth, T_out)


# ----------------------------------------------------------------------------
# Parameter init (deterministic, synthetic)
# ----------------------------------------------------------------------------
def init_params(key, in_depth, res_channels, skip_channels, dilations):
    def nrm(k, shape, scale=0.2):
        return scale * jax.random.normal(k, shape, dtype=jnp.float32)

    params = {}
    key, k = jax.random.split(key)
    params['embedding'] = nrm(k, (in_depth, res_channels), 1.0)
    blocks = []
    for _ in dilations:
        keys = jax.random.split(key, 9)
        key = keys[0]
        blocks.append({
            'wf0': nrm(keys[1], (res_channels, res_channels)),   # filter conv, tap 0
            'wf1': nrm(keys[2], (res_channels, res_channels)),   # filter conv, tap 1
            'wg0': nrm(keys[3], (res_channels, res_channels)),   # gate conv, tap 0
            'wg1': nrm(keys[4], (res_channels, res_channels)),   # gate conv, tap 1
            'ws':  nrm(keys[5], (res_channels, skip_channels)),  # skip 1x1
            'bs':  nrm(keys[6], (1, skip_channels)),
            'wr':  nrm(keys[7], (res_channels, res_channels)),   # residual 1x1
            'br':  nrm(keys[8], (1, res_channels)),
        })
    params['blocks'] = blocks
    keys = jax.random.split(key, 5)
    params['post'] = {
        'w1': nrm(keys[1], (skip_channels, skip_channels)),
        'b1': nrm(keys[2], (1, skip_channels)),
        'w2': nrm(keys[3], (skip_channels, in_depth)),
        'b2': nrm(keys[4], (1, in_depth)),
    }
    return params


# ----------------------------------------------------------------------------
# Pure-JAX reference (lax.conv_general_dilated) for correctness check
# ----------------------------------------------------------------------------
def wavenet_reference(tokens, params, dilations):
    emb = jnp.take(params['embedding'], tokens, axis=0)       # (B, T, C)
    x = jnp.transpose(emb, (0, 2, 1))                         # (B, C, T)  NCL
    skips = []
    dn = ('NCH', 'OIH', 'NCH')
    for p, d in zip(params['blocks'], dilations):
        wf = jnp.stack([p['wf0'].T, p['wf1'].T], axis=-1)     # (O, I, K=2)
        wg = jnp.stack([p['wg0'].T, p['wg1'].T], axis=-1)
        f = lax.conv_general_dilated(x, wf, (1,), 'VALID', rhs_dilation=(d,),
                                     dimension_numbers=dn)
        g = lax.conv_general_dilated(x, wg, (1,), 'VALID', rhs_dilation=(d,),
                                     dimension_numbers=dn)
        z = jax.nn.sigmoid(g) * jnp.tanh(f)                   # (B, C, Lout)
        skip = jnp.einsum('bcl,cs->bsl', z, p['ws']) + p['bs'].T[None]
        res = (jnp.einsum('bcl,co->bol', z, p['wr']) + p['br'].T[None]
               + x[:, :, -z.shape[-1]:])
        skips.append(skip)
        x = res
    l_final = x.shape[-1]
    s = sum(sk[:, :, -l_final:] for sk in skips)
    s = jnp.maximum(s, 0.0)
    h = jnp.einsum('bsl,so->bol', s, params['post']['w1']) + params['post']['b1'].T[None]
    h = jnp.maximum(h, 0.0)
    o = jnp.einsum('bhl,hd->bdl', h, params['post']['w2']) + params['post']['b2'].T[None]
    return o


if __name__ == "__main__":
    # Small, self-consistent WaveNet config.
    IN_DEPTH, RES_CH, SKIP_CH = 16, 8, 16
    DILATION_DEPTH, N_REPEAT = 3, 2
    B, T = 2, 32
    dilations = tuple(2 ** i for i in range(DILATION_DEPTH)) * N_REPEAT   # sum = 14

    key = jax.random.PRNGKey(0)
    key, pkey, tkey = jax.random.split(key, 3)
    params = init_params(pkey, IN_DEPTH, RES_CH, SKIP_CH, dilations)
    tokens = jax.random.randint(tkey, (B, T), 0, IN_DEPTH, dtype=jnp.int32)

    out = wavenet_forward(tokens, params, dilations)
    out = jax.block_until_ready(out)

    ref = wavenet_reference(tokens, params, dilations)
    l_final = T - sum(dilations)
    assert out.shape == (B, IN_DEPTH, l_final), out.shape
    assert ref.shape == out.shape, (ref.shape, out.shape)
    err = float(jnp.max(jnp.abs(out - ref)))
    # bf16 GEMM operands (f32 accumulation) vs an all-f32 reference: loosened
    # tolerance per the perf review; structural bugs would be O(output scale).
    assert err < 1e-1, f"mismatch vs reference: {err}"

    print("KERNEL_OK")
</pallas_src>

<mosaic_0001>
module attributes {stable_mosaic.version = 11 : i64} {
  func.func @_wavenet_kernel(%arg0: i32, %arg1: memref<1x8x32xf32, #tpu.memory_space<vmem>>, %arg2: memref<6x8x8xbf16, #tpu.memory_space<vmem>>, %arg3: memref<6x8x8xbf16, #tpu.memory_space<vmem>>, %arg4: memref<6x8x8xbf16, #tpu.memory_space<vmem>>, %arg5: memref<6x8x8xbf16, #tpu.memory_space<vmem>>, %arg6: memref<6x16x8xbf16, #tpu.memory_space<vmem>>, %arg7: memref<6x8x8xbf16, #tpu.memory_space<vmem>>, %arg8: memref<6x8x1xf32, #tpu.memory_space<vmem>>, %arg9: memref<1x16xf32, #tpu.memory_space<vmem>>, %arg10: memref<16x16xbf16, #tpu.memory_space<vmem>>, %arg11: memref<1x16xf32, #tpu.memory_space<vmem>>, %arg12: memref<16x128xbf16, #tpu.memory_space<vmem>>, %arg13: memref<1x128xf32, #tpu.memory_space<vmem>>, %arg14: memref<1x32x128xf32, #tpu.memory_space<vmem>>) attributes {dimension_semantics = [#tpu.dimension_semantics<parallel>], iteration_bounds = array<i64: 2>, scalar_prefetch = 0 : i64, scratch_operands = 0 : i64, tpu.core_type = #tpu.core_type<tc>, window_params = [{transform_indices = @transform_0, window_bounds = array<i64: 1, 8, 32>}, {pipeline_mode = #tpu.pipeline_mode<synchronous>, transform_indices = @transform_1, window_bounds = array<i64: 6, 8, 8>}, {pipeline_mode = #tpu.pipeline_mode<synchronous>, transform_indices = @transform_2, window_bounds = array<i64: 6, 8, 8>}, {pipeline_mode = #tpu.pipeline_mode<synchronous>, transform_indices = @transform_3, window_bounds = array<i64: 6, 8, 8>}, {pipeline_mode = #tpu.pipeline_mode<synchronous>, transform_indices = @transform_4, window_bounds = array<i64: 6, 8, 8>}, {pipeline_mode = #tpu.pipeline_mode<synchronous>, transform_indices = @transform_5, window_bounds = array<i64: 6, 16, 8>}, {pipeline_mode = #tpu.pipeline_mode<synchronous>, transform_indices = @transform_6, window_bounds = array<i64: 6, 8, 8>}, {pipeline_mode = #tpu.pipeline_mode<synchronous>, transform_indices = @transform_7, window_bounds = array<i64: 6, 8, 1>}, {pipeline_mode = #tpu.pipeline_mode<synchronous>, transform_indices = @transform_8, window_bounds = array<i64: 1, 16>}, {pipeline_mode = #tpu.pipeline_mode<synchronous>, transform_indices = @transform_9, window_bounds = array<i64: 16, 16>}, {pipeline_mode = #tpu.pipeline_mode<synchronous>, transform_indices = @transform_10, window_bounds = array<i64: 1, 16>}, {pipeline_mode = #tpu.pipeline_mode<synchronous>, transform_indices = @transform_11, window_bounds = array<i64: 16, 128>}, {pipeline_mode = #tpu.pipeline_mode<synchronous>, transform_indices = @transform_12, window_bounds = array<i64: 1, 128>}, {transform_indices = @transform_13, window_bounds = array<i64: 1, 32, 128>}]} {
    %c0 = arith.constant 0 : index
    %c0_0 = arith.constant 0 : index
    %c0_1 = arith.constant 0 : index
    %0 = vector.load %arg1[%c0, %c0_0, %c0_1] : memref<1x8x32xf32, #tpu.memory_space<vmem>>, vector<1x8x32xf32>
    %1 = vector.shape_cast %0 : vector<1x8x32xf32> to vector<8x32xf32>
    %cst = arith.constant 0.000000e+00 : f32
    %2 = vector.broadcast %cst : f32 to vector<16x32xf32>
    %3 = arith.truncf %1 : vector<8x32xf32> to vector<8x32xbf16>
    %c1_i32 = arith.constant 1 : i32
    %4 = tpu.dynamic_rotate %1 by %c1_i32 dim 1 : vector<8x32xf32>, i32 -> vector<8x32xf32>
    %5 = arith.truncf %4 : vector<8x32xf32> to vector<8x32xbf16>
    %c0_2 = arith.constant 0 : index
    %c0_3 = arith.constant 0 : index
    %c0_4 = arith.constant 0 : index
    %6 = vector.load %arg2[%c0_2, %c0_3, %c0_4] : memref<6x8x8xbf16, #tpu.memory_space<vmem>>, vector<1x8x8xbf16>
    %7 = vector.shape_cast %6 : vector<1x8x8xbf16> to vector<8x8xbf16>
    %cst_5 = arith.constant dense<0.000000e+00> : vector<8x32xf32>
    %8 = tpu.matmul %7, %5, %cst_5 {dimension_numbers = #tpu.dot_dimension_numbers<[1], [0], [0], [1], [0, 0, 1, 1], [], []>} : vector<8x8xbf16>, vector<8x32xbf16>, vector<8x32xf32> -> vector<8x32xf32>
    %c0_6 = arith.constant 0 : index
    %c0_7 = arith.constant 0 : index
    %c0_8 = arith.constant 0 : index
    %9 = vector.load %arg3[%c0_6, %c0_7, %c0_8] : memref<6x8x8xbf16, #tpu.memory_space<vmem>>, vector<1x8x8xbf16>
    %10 = vector.shape_cast %9 : vector<1x8x8xbf16> to vector<8x8xbf16>
    %cst_9 = arith.constant dense<0.000000e+00> : vector<8x32xf32>
    %11 = tpu.matmul %10, %3, %cst_9 {dimension_numbers = #tpu.dot_dimension_numbers<[1], [0], [0], [1], [0, 0, 1, 1], [], []>} : vector<8x8xbf16>, vector<8x32xbf16>, vector<8x32xf32> -> vector<8x32xf32>
    %12 = arith.addf %8, %11 : vector<8x32xf32>
    %c0_10 = arith.constant 0 : index
    %c0_11 = arith.constant 0 : index
    %c0_12 = arith.constant 0 : index
    %13 = vector.load %arg4[%c0_10, %c0_11, %c0_12] : memref<6x8x8xbf16, #tpu.memory_space<vmem>>, vector<1x8x8xbf16>
    %14 = vector.shape_cast %13 : vector<1x8x8xbf16> to vector<8x8xbf16>
    %cst_13 = arith.constant dense<0.000000e+00> : vector<8x32xf32>
    %15 = tpu.matmul %14, %5, %cst_13 {dimension_numbers = #tpu.dot_dimension_numbers<[1], [0], [0], [1], [0, 0, 1, 1], [], []>} : vector<8x8xbf16>, vector<8x32xbf16>, vector<8x32xf32> -> vector<8x32xf32>
    %c0_14 = arith.constant 0 : index
    %c0_15 = arith.constant 0 : index
    %c0_16 = arith.constant 0 : index
    %16 = vector.load %arg5[%c0_14, %c0_15, %c0_16] : memref<6x8x8xbf16, #tpu.memory_space<vmem>>, vector<1x8x8xbf16>
    %17 = vector.shape_cast %16 : vector<1x8x8xbf16> to vector<8x8xbf16>
    %cst_17 = arith.constant dense<0.000000e+00> : vector<8x32xf32>
    %18 = tpu.matmul %17, %3, %cst_17 {dimension_numbers = #tpu.dot_dimension_numbers<[1], [0], [0], [1], [0, 0, 1, 1], [], []>} : vector<8x8xbf16>, vector<8x32xbf16>, vector<8x32xf32> -> vector<8x32xf32>
    %19 = arith.addf %15, %18 : vector<8x32xf32>
    %20 = math.tanh %12 : vector<8x32xf32>
    %21 = arith.negf %19 : vector<8x32xf32>
    %22 = math.exp %21 : vector<8x32xf32>
    %cst_18 = arith.constant 1.000000e+00 : f32
    %23 = vector.broadcast %cst_18 : f32 to vector<8x32xf32>
    %24 = arith.addf %23, %22 : vector<8x32xf32>
    %25 = arith.divf %23, %24 : vector<8x32xf32>
    %26 = arith.mulf %20, %25 : vector<8x32xf32>
    %27 = arith.truncf %26 : vector<8x32xf32> to vector<8x32xbf16>
    %c0_19 = arith.constant 0 : index
    %c0_20 = arith.constant 0 : index
    %c0_21 = arith.constant 0 : index
    %28 = vector.load %arg6[%c0_19, %c0_20, %c0_21] : memref<6x16x8xbf16, #tpu.memory_space<vmem>>, vector<1x16x8xbf16>
    %29 = vector.shape_cast %28 : vector<1x16x8xbf16> to vector<16x8xbf16>
    %cst_22 = arith.constant dense<0.000000e+00> : vector<16x32xf32>
    %30 = tpu.matmul %29, %27, %cst_22 {dimension_numbers = #tpu.dot_dimension_numbers<[1], [0], [0], [1], [0, 0, 1, 1], [], []>} : vector<16x8xbf16>, vector<8x32xbf16>, vector<16x32xf32> -> vector<16x32xf32>
    %31 = arith.addf %2, %30 : vector<16x32xf32>
    %c0_23 = arith.constant 0 : index
    %c0_24 = arith.constant 0 : index
    %c0_25 = arith.constant 0 : index
    %32 = vector.load %arg7[%c0_23, %c0_24, %c0_25] : memref<6x8x8xbf16, #tpu.memory_space<vmem>>, vector<1x8x8xbf16>
    %33 = vector.shape_cast %32 : vector<1x8x8xbf16> to vector<8x8xbf16>
    %cst_26 = arith.constant dense<0.000000e+00> : vector<8x32xf32>
    %34 = tpu.matmul %33, %27, %cst_26 {dimension_numbers = #tpu.dot_dimension_numbers<[1], [0], [0], [1], [0, 0, 1, 1], [], []>} : vector<8x8xbf16>, vector<8x32xbf16>, vector<8x32xf32> -> vector<8x32xf32>
    %c0_27 = arith.constant 0 : index
    %c0_28 = arith.constant 0 : index
    %c0_29 = arith.constant 0 : index
    %35 = vector.load %arg8[%c0_27, %c0_28, %c0_29] : memref<6x8x1xf32, #tpu.memory_space<vmem>>, vector<1x8x1xf32>
    %36 = vector.shape_cast %35 : vector<1x8x1xf32> to vector<8x1xf32>
    %37 = vector.broadcast %36 : vector<8x1xf32> to vector<8x32xf32>
    %38 = arith.addf %34, %37 : vector<8x32xf32>
    %39 = arith.addf %38, %1 : vector<8x32xf32>
    %40 = arith.truncf %39 : vector<8x32xf32> to vector<8x32xbf16>
    %c2_i32 = arith.constant 2 : i32
    %41 = tpu.dynamic_rotate %39 by %c2_i32 dim 1 : vector<8x32xf32>, i32 -> vector<8x32xf32>
    %42 = arith.truncf %41 : vector<8x32xf32> to vector<8x32xbf16>
    %c1 = arith.constant 1 : index
    %c0_30 = arith.constant 0 : index
    %c0_31 = arith.constant 0 : index
    %43 = vector.load %arg2[%c1, %c0_30, %c0_31] : memref<6x8x8xbf16, #tpu.memory_space<vmem>>, vector<1x8x8xbf16>
    %44 = vector.shape_cast %43 : vector<1x8x8xbf16> to vector<8x8xbf16>
    %cst_32 = arith.constant dense<0.000000e+00> : vector<8x32xf32>
    %45 = tpu.matmul %44, %42, %cst_32 {dimension_numbers = #tpu.dot_dimension_numbers<[1], [0], [0], [1], [0, 0, 1, 1], [], []>} : vector<8x8xbf16>, vector<8x32xbf16>, vector<8x32xf32> -> vector<8x32xf32>
    %c1_33 = arith.constant 1 : index
    %c0_34 = arith.constant 0 : index
    %c0_35 = arith.constant 0 : index
    %46 = vector.load %arg3[%c1_33, %c0_34, %c0_35] : memref<6x8x8xbf16, #tpu.memory_space<vmem>>, vector<1x8x8xbf16>
    %47 = vector.shape_cast %46 : vector<1x8x8xbf16> to vector<8x8xbf16>
    %cst_36 = arith.constant dense<0.000000e+00> : vector<8x32xf32>
    %48 = tpu.matmul %47, %40, %cst_36 {dimension_numbers = #tpu.dot_dimension_numbers<[1], [0], [0], [1], [0, 0, 1, 1], [], []>} : vector<8x8xbf16>, vector<8x32xbf16>, vector<8x32xf32> -> vector<8x32xf32>
    %49 = arith.addf %45, %48 : vector<8x32xf32>
    %c1_37 = arith.constant 1 : index
    %c0_38 = arith.constant 0 : index
    %c0_39 = arith.constant 0 : index
    %50 = vector.load %arg4[%c1_37, %c0_38, %c0_39] : memref<6x8x8xbf16, #tpu.memory_space<vmem>>, vector<1x8x8xbf16>
    %51 = vector.shape_cast %50 : vector<1x8x8xbf16> to vector<8x8xbf16>
    %cst_40 = arith.constant dense<0.000000e+00> : vector<8x32xf32>
    %52 = tpu.matmul %51, %42, %cst_40 {dimension_numbers = #tpu.dot_dimension_numbers<[1], [0], [0], [1], [0, 0, 1, 1], [], []>} : vector<8x8xbf16>, vector<8x32xbf16>, vector<8x32xf32> -> vector<8x32xf32>
    %c1_41 = arith.constant 1 : index
    %c0_42 = arith.constant 0 : index
    %c0_43 = arith.constant 0 : index
    %53 = vector.load %arg5[%c1_41, %c0_42, %c0_43] : memref<6x8x8xbf16, #tpu.memory_space<vmem>>, vector<1x8x8xbf16>
    %54 = vector.shape_cast %53 : vector<1x8x8xbf16> to vector<8x8xbf16>
    %cst_44 = arith.constant dense<0.000000e+00> : vector<8x32xf32>
    %55 = tpu.matmul %54, %40, %cst_44 {dimension_numbers = #tpu.dot_dimension_numbers<[1], [0], [0], [1], [0, 0, 1, 1], [], []>} : vector<8x8xbf16>, vector<8x32xbf16>, vector<8x32xf32> -> vector<8x32xf32>
    %56 = arith.addf %52, %55 : vector<8x32xf32>
    %57 = math.tanh %49 : vector<8x32xf32>
    %58 = arith.negf %56 : vector<8x32xf32>
    %59 = math.exp %58 : vector<8x32xf32>
    %cst_45 = arith.constant 1.000000e+00 : f32
    %60 = vector.broadcast %cst_45 : f32 to vector<8x32xf32>
    %61 = arith.addf %60, %59 : vector<8x32xf32>
    %62 = arith.divf %60, %61 : vector<8x32xf32>
    %63 = arith.mulf %57, %62 : vector<8x32xf32>
    %64 = arith.truncf %63 : vector<8x32xf32> to vector<8x32xbf16>
    %c1_46 = arith.constant 1 : index
    %c0_47 = arith.constant 0 : index
    %c0_48 = arith.constant 0 : index
    %65 = vector.load %arg6[%c1_46, %c0_47, %c0_48] : memref<6x16x8xbf16, #tpu.memory_space<vmem>>, vector<1x16x8xbf16>
    %66 = vector.shape_cast %65 : vector<1x16x8xbf16> to vector<16x8xbf16>
    %cst_49 = arith.constant dense<0.000000e+00> : vector<16x32xf32>
    %67 = tpu.matmul %66, %64, %cst_49 {dimension_numbers = #tpu.dot_dimension_numbers<[1], [0], [0], [1], [0, 0, 1, 1], [], []>} : vector<16x8xbf16>, vector<8x32xbf16>, vector<16x32xf32> -> vector<16x32xf32>
    %68 = arith.addf %31, %67 : vector<16x32xf32>
    %c1_50 = arith.constant 1 : index
    %c0_51 = arith.constant 0 : index
    %c0_52 = arith.constant 0 : index
    %69 = vector.load %arg7[%c1_50, %c0_51, %c0_52] : memref<6x8x8xbf16, #tpu.memory_space<vmem>>, vector<1x8x8xbf16>
    %70 = vector.shape_cast %69 : vector<1x8x8xbf16> to vector<8x8xbf16>
    %cst_53 = arith.constant dense<0.000000e+00> : vector<8x32xf32>
    %71 = tpu.matmul %70, %64, %cst_53 {dimension_numbers = #tpu.dot_dimension_numbers<[1], [0], [0], [1], [0, 0, 1, 1], [], []>} : vector<8x8xbf16>, vector<8x32xbf16>, vector<8x32xf32> -> vector<8x32xf32>
    %c1_54 = arith.constant 1 : index
    %c0_55 = arith.constant 0 : index
    %c0_56 = arith.constant 0 : index
    %72 = vector.load %arg8[%c1_54, %c0_55, %c0_56] : memref<6x8x1xf32, #tpu.memory_space<vmem>>, vector<1x8x1xf32>
    %73 = vector.shape_cast %72 : vector<1x8x1xf32> to vector<8x1xf32>
    %74 = vector.broadcast %73 : vector<8x1xf32> to vector<8x32xf32>
    %75 = arith.addf %71, %74 : vector<8x32xf32>
    %76 = arith.addf %75, %39 : vector<8x32xf32>
    %77 = arith.truncf %76 : vector<8x32xf32> to vector<8x32xbf16>
    %c4_i32 = arith.constant 4 : i32
    %78 = tpu.dynamic_rotate %76 by %c4_i32 dim 1 : vector<8x32xf32>, i32 -> vector<8x32xf32>
    %79 = arith.truncf %78 : vector<8x32xf32> to vector<8x32xbf16>
    %c2 = arith.constant 2 : index
    %c0_57 = arith.constant 0 : index
    %c0_58 = arith.constant 0 : index
    %80 = vector.load %arg2[%c2, %c0_57, %c0_58] : memref<6x8x8xbf16, #tpu.memory_space<vmem>>, vector<1x8x8xbf16>
    %81 = vector.shape_cast %80 : vector<1x8x8xbf16> to vector<8x8xbf16>
    %cst_59 = arith.constant dense<0.000000e+00> : vector<8x32xf32>
    %82 = tpu.matmul %81, %79, %cst_59 {dimension_numbers = #tpu.dot_dimension_numbers<[1], [0], [0], [1], [0, 0, 1, 1], [], []>} : vector<8x8xbf16>, vector<8x32xbf16>, vector<8x32xf32> -> vector<8x32xf32>
    %c2_60 = arith.constant 2 : index
    %c0_61 = arith.constant 0 : index
    %c0_62 = arith.constant 0 : index
    %83 = vector.load %arg3[%c2_60, %c0_61, %c0_62] : memref<6x8x8xbf16, #tpu.memory_space<vmem>>, vector<1x8x8xbf16>
    %84 = vector.shape_cast %83 : vector<1x8x8xbf16> to vector<8x8xbf16>
    %cst_63 = arith.constant dense<0.000000e+00> : vector<8x32xf32>
    %85 = tpu.matmul %84, %77, %cst_63 {dimension_numbers = #tpu.dot_dimension_numbers<[1], [0], [0], [1], [0, 0, 1, 1], [], []>} : vector<8x8xbf16>, vector<8x32xbf16>, vector<8x32xf32> -> vector<8x32xf32>
    %86 = arith.addf %82, %85 : vector<8x32xf32>
    %c2_64 = arith.constant 2 : index
    %c0_65 = arith.constant 0 : index
    %c0_66 = arith.constant 0 : index
    %87 = vector.load %arg4[%c2_64, %c0_65, %c0_66] : memref<6x8x8xbf16, #tpu.memory_space<vmem>>, vector<1x8x8xbf16>
    %88 = vector.shape_cast %87 : vector<1x8x8xbf16> to vector<8x8xbf16>
    %cst_67 = arith.constant dense<0.000000e+00> : vector<8x32xf32>
    %89 = tpu.matmul %88, %79, %cst_67 {dimension_numbers = #tpu.dot_dimension_numbers<[1], [0], [0], [1], [0, 0, 1, 1], [], []>} : vector<8x8xbf16>, vector<8x32xbf16>, vector<8x32xf32> -> vector<8x32xf32>
    %c2_68 = arith.constant 2 : index
    %c0_69 = arith.constant 0 : index
    %c0_70 = arith.constant 0 : index
    %90 = vector.load %arg5[%c2_68, %c0_69, %c0_70] : memref<6x8x8xbf16, #tpu.memory_space<vmem>>, vector<1x8x8xbf16>
    %91 = vector.shape_cast %90 : vector<1x8x8xbf16> to vector<8x8xbf16>
    %cst_71 = arith.constant dense<0.000000e+00> : vector<8x32xf32>
    %92 = tpu.matmul %91, %77, %cst_71 {dimension_numbers = #tpu.dot_dimension_numbers<[1], [0], [0], [1], [0, 0, 1, 1], [], []>} : vector<8x8xbf16>, vector<8x32xbf16>, vector<8x32xf32> -> vector<8x32xf32>
    %93 = arith.addf %89, %92 : vector<8x32xf32>
    %94 = math.tanh %86 : vector<8x32xf32>
    %95 = arith.negf %93 : vector<8x32xf32>
    %96 = math.exp %95 : vector<8x32xf32>
    %cst_72 = arith.constant 1.000000e+00 : f32
    %97 = vector.broadcast %cst_72 : f32 to vector<8x32xf32>
    %98 = arith.addf %97, %96 : vector<8x32xf32>
    %99 = arith.divf %97, %98 : vector<8x32xf32>
    %100 = arith.mulf %94, %99 : vector<8x32xf32>
    %101 = arith.truncf %100 : vector<8x32xf32> to vector<8x32xbf16>
    %c2_73 = arith.constant 2 : index
    %c0_74 = arith.constant 0 : index
    %c0_75 = arith.constant 0 : index
    %102 = vector.load %arg6[%c2_73, %c0_74, %c0_75] : memref<6x16x8xbf16, #tpu.memory_space<vmem>>, vector<1x16x8xbf16>
    %103 = vector.shape_cast %102 : vector<1x16x8xbf16> to vector<16x8xbf16>
    %cst_76 = arith.constant dense<0.000000e+00> : vector<16x32xf32>
    %104 = tpu.matmul %103, %101, %cst_76 {dimension_numbers = #tpu.dot_dimension_numbers<[1], [0], [0], [1], [0, 0, 1, 1], [], []>} : vector<16x8xbf16>, vector<8x32xbf16>, vector<16x32xf32> -> vector<16x32xf32>
    %105 = arith.addf %68, %104 : vector<16x32xf32>
    %c2_77 = arith.constant 2 : index
    %c0_78 = arith.constant 0 : index
    %c0_79 = arith.constant 0 : index
    %106 = vector.load %arg7[%c2_77, %c0_78, %c0_79] : memref<6x8x8xbf16, #tpu.memory_space<vmem>>, vector<1x8x8xbf16>
    %107 = vector.shape_cast %106 : vector<1x8x8xbf16> to vector<8x8xbf16>
    %cst_80 = arith.constant dense<0.000000e+00> : vector<8x32xf32>
    %108 = tpu.matmul %107, %101, %cst_80 {dimension_numbers = #tpu.dot_dimension_numbers<[1], [0], [0], [1], [0, 0, 1, 1], [], []>} : vector<8x8xbf16>, vector<8x32xbf16>, vector<8x32xf32> -> vector<8x32xf32>
    %c2_81 = arith.constant 2 : index
    %c0_82 = arith.constant 0 : index
    %c0_83 = arith.constant 0 : index
    %109 = vector.load %arg8[%c2_81, %c0_82, %c0_83] : memref<6x8x1xf32, #tpu.memory_space<vmem>>, vector<1x8x1xf32>
    %110 = vector.shape_cast %109 : vector<1x8x1xf32> to vector<8x1xf32>
    %111 = vector.broadcast %110 : vector<8x1xf32> to vector<8x32xf32>
    %112 = arith.addf %108, %111 : vector<8x32xf32>
    %113 = arith.addf %112, %76 : vector<8x32xf32>
    %114 = arith.truncf %113 : vector<8x32xf32> to vector<8x32xbf16>
    %c1_i32_84 = arith.constant 1 : i32
    %115 = tpu.dynamic_rotate %113 by %c1_i32_84 dim 1 : vector<8x32xf32>, i32 -> vector<8x32xf32>
    %116 = arith.truncf %115 : vector<8x32xf32> to vector<8x32xbf16>
    %c3 = arith.constant 3 : index
    %c0_85 = arith.constant 0 : index
    %c0_86 = arith.constant 0 : index
    %117 = vector.load %arg2[%c3, %c0_85, %c0_86] : memref<6x8x8xbf16, #tpu.memory_space<vmem>>, vector<1x8x8xbf16>
    %118 = vector.shape_cast %117 : vector<1x8x8xbf16> to vector<8x8xbf16>
    %cst_87 = arith.constant dense<0.000000e+00> : vector<8x32xf32>
    %119 = tpu.matmul %118, %116, %cst_87 {dimension_numbers = #tpu.dot_dimension_numbers<[1], [0], [0], [1], [0, 0, 1, 1], [], []>} : vector<8x8xbf16>, vector<8x32xbf16>, vector<8x32xf32> -> vector<8x32xf32>
    %c3_88 = arith.constant 3 : index
    %c0_89 = arith.constant 0 : index
    %c0_90 = arith.constant 0 : index
    %120 = vector.load %arg3[%c3_88, %c0_89, %c0_90] : memref<6x8x8xbf16, #tpu.memory_space<vmem>>, vector<1x8x8xbf16>
    %121 = vector.shape_cast %120 : vector<1x8x8xbf16> to vector<8x8xbf16>
    %cst_91 = arith.constant dense<0.000000e+00> : vector<8x32xf32>
    %122 = tpu.matmul %121, %114, %cst_91 {dimension_numbers = #tpu.dot_dimension_numbers<[1], [0], [0], [1], [0, 0, 1, 1], [], []>} : vector<8x8xbf16>, vector<8x32xbf16>, vector<8x32xf32> -> vector<8x32xf32>
    %123 = arith.addf %119, %122 : vector<8x32xf32>
    %c3_92 = arith.constant 3 : index
    %c0_93 = arith.constant 0 : index
    %c0_94 = arith.constant 0 : index
    %124 = vector.load %arg4[%c3_92, %c0_93, %c0_94] : memref<6x8x8xbf16, #tpu.memory_space<vmem>>, vector<1x8x8xbf16>
    %125 = vector.shape_cast %124 : vector<1x8x8xbf16> to vector<8x8xbf16>
    %cst_95 = arith.constant dense<0.000000e+00> : vector<8x32xf32>
    %126 = tpu.matmul %125, %116, %cst_95 {dimension_numbers = #tpu.dot_dimension_numbers<[1], [0], [0], [1], [0, 0, 1, 1], [], []>} : vector<8x8xbf16>, vector<8x32xbf16>, vector<8x32xf32> -> vector<8x32xf32>
    %c3_96 = arith.constant 3 : index
    %c0_97 = arith.constant 0 : index
    %c0_98 = arith.constant 0 : index
    %127 = vector.load %arg5[%c3_96, %c0_97, %c0_98] : memref<6x8x8xbf16, #tpu.memory_space<vmem>>, vector<1x8x8xbf16>
    %128 = vector.shape_cast %127 : vector<1x8x8xbf16> to vector<8x8xbf16>
    %cst_99 = arith.constant dense<0.000000e+00> : vector<8x32xf32>
    %129 = tpu.matmul %128, %114, %cst_99 {dimension_numbers = #tpu.dot_dimension_numbers<[1], [0], [0], [1], [0, 0, 1, 1], [], []>} : vector<8x8xbf16>, vector<8x32xbf16>, vector<8x32xf32> -> vector<8x32xf32>
    %130 = arith.addf %126, %129 : vector<8x32xf32>
    %131 = math.tanh %123 : vector<8x32xf32>
    %132 = arith.negf %130 : vector<8x32xf32>
    %133 = math.exp %132 : vector<8x32xf32>
    %cst_100 = arith.constant 1.000000e+00 : f32
    %134 = vector.broadcast %cst_100 : f32 to vector<8x32xf32>
    %135 = arith.addf %134, %133 : vector<8x32xf32>
    %136 = arith.divf %134, %135 : vector<8x32xf32>
    %137 = arith.mulf %131, %136 : vector<8x32xf32>
    %138 = arith.truncf %137 : vector<8x32xf32> to vector<8x32xbf16>
    %c3_101 = arith.constant 3 : index
    %c0_102 = arith.constant 0 : index
    %c0_103 = arith.constant 0 : index
    %139 = vector.load %arg6[%c3_101, %c0_102, %c0_103] : memref<6x16x8xbf16, #tpu.memory_space<vmem>>, vector<1x16x8xbf16>
    %140 = vector.shape_cast %139 : vector<1x16x8xbf16> to vector<16x8xbf16>
    %cst_104 = arith.constant dense<0.000000e+00> : vector<16x32xf32>
    %141 = tpu.matmul %140, %138, %cst_104 {dimension_numbers = #tpu.dot_dimension_numbers<[1], [0], [0], [1], [0, 0, 1, 1], [], []>} : vector<16x8xbf16>, vector<8x32xbf16>, vector<16x32xf32> -> vector<16x32xf32>
    %142 = arith.addf %105, %141 : vector<16x32xf32>
    %c3_105 = arith.constant 3 : index
    %c0_106 = arith.constant 0 : index
    %c0_107 = arith.constant 0 : index
    %143 = vector.load %arg7[%c3_105, %c0_106, %c0_107] : memref<6x8x8xbf16, #tpu.memory_space<vmem>>, vector<1x8x8xbf16>
    %144 = vector.shape_cast %143 : vector<1x8x8xbf16> to vector<8x8xbf16>
    %cst_108 = arith.constant dense<0.000000e+00> : vector<8x32xf32>
    %145 = tpu.matmul %144, %138, %cst_108 {dimension_numbers = #tpu.dot_dimension_numbers<[1], [0], [0], [1], [0, 0, 1, 1], [], []>} : vector<8x8xbf16>, vector<8x32xbf16>, vector<8x32xf32> -> vector<8x32xf32>
    %c3_109 = arith.constant 3 : index
    %c0_110 = arith.constant 0 : index
    %c0_111 = arith.constant 0 : index
    %146 = vector.load %arg8[%c3_109, %c0_110, %c0_111] : memref<6x8x1xf32, #tpu.memory_space<vmem>>, vector<1x8x1xf32>
    %147 = vector.shape_cast %146 : vector<1x8x1xf32> to vector<8x1xf32>
    %148 = vector.broadcast %147 : vector<8x1xf32> to vector<8x32xf32>
    %149 = arith.addf %145, %148 : vector<8x32xf32>
    %150 = arith.addf %149, %113 : vector<8x32xf32>
    %151 = arith.truncf %150 : vector<8x32xf32> to vector<8x32xbf16>
    %c2_i32_112 = arith.constant 2 : i32
    %152 = tpu.dynamic_rotate %150 by %c2_i32_112 dim 1 : vector<8x32xf32>, i32 -> vector<8x32xf32>
    %153 = arith.truncf %152 : vector<8x32xf32> to vector<8x32xbf16>
    %c4 = arith.constant 4 : index
    %c0_113 = arith.constant 0 : index
    %c0_114 = arith.constant 0 : index
    %154 = vector.load %arg2[%c4, %c0_113, %c0_114] : memref<6x8x8xbf16, #tpu.memory_space<vmem>>, vector<1x8x8xbf16>
    %155 = vector.shape_cast %154 : vector<1x8x8xbf16> to vector<8x8xbf16>
    %cst_115 = arith.constant dense<0.000000e+00> : vector<8x32xf32>
    %156 = tpu.matmul %155, %153, %cst_115 {dimension_numbers = #tpu.dot_dimension_numbers<[1], [0], [0], [1], [0, 0, 1, 1], [], []>} : vector<8x8xbf16>, vector<8x32xbf16>, vector<8x32xf32> -> vector<8x32xf32>
    %c4_116 = arith.constant 4 : index
    %c0_117 = arith.constant 0 : index
    %c0_118 = arith.constant 0 : index
    %157 = vector.load %arg3[%c4_116, %c0_117, %c0_118] : memref<6x8x8xbf16, #tpu.memory_space<vmem>>, vector<1x8x8xbf16>
    %158 = vector.shape_cast %157 : vector<1x8x8xbf16> to vector<8x8xbf16>
    %cst_119 = arith.constant dense<0.000000e+00> : vector<8x32xf32>
    %159 = tpu.matmul %158, %151, %cst_119 {dimension_numbers = #tpu.dot_dimension_numbers<[1], [0], [0], [1], [0, 0, 1, 1], [], []>} : vector<8x8xbf16>, vector<8x32xbf16>, vector<8x32xf32> -> vector<8x32xf32>
    %160 = arith.addf %156, %159 : vector<8x32xf32>
    %c4_120 = arith.constant 4 : index
    %c0_121 = arith.constant 0 : index
    %c0_122 = arith.constant 0 : index
    %161 = vector.load %arg4[%c4_120, %c0_121, %c0_122] : memref<6x8x8xbf16, #tpu.memory_space<vmem>>, vector<1x8x8xbf16>
    %162 = vector.shape_cast %161 : vector<1x8x8xbf16> to vector<8x8xbf16>
    %cst_123 = arith.constant dense<0.000000e+00> : vector<8x32xf32>
    %163 = tpu.matmul %162, %153, %cst_123 {dimension_numbers = #tpu.dot_dimension_numbers<[1], [0], [0], [1], [0, 0, 1, 1], [], []>} : vector<8x8xbf16>, vector<8x32xbf16>, vector<8x32xf32> -> vector<8x32xf32>
    %c4_124 = arith.constant 4 : index
    %c0_125 = arith.constant 0 : index
    %c0_126 = arith.constant 0 : index
    %164 = vector.load %arg5[%c4_124, %c0_125, %c0_126] : memref<6x8x8xbf16, #tpu.memory_space<vmem>>, vector<1x8x8xbf16>
    %165 = vector.shape_cast %164 : vector<1x8x8xbf16> to vector<8x8xbf16>
    %cst_127 = arith.constant dense<0.000000e+00> : vector<8x32xf32>
    %166 = tpu.matmul %165, %151, %cst_127 {dimension_numbers = #tpu.dot_dimension_numbers<[1], [0], [0], [1], [0, 0, 1, 1], [], []>} : vector<8x8xbf16>, vector<8x32xbf16>, vector<8x32xf32> -> vector<8x32xf32>
    %167 = arith.addf %163, %166 : vector<8x32xf32>
    %168 = math.tanh %160 : vector<8x32xf32>
    %169 = arith.negf %167 : vector<8x32xf32>
    %170 = math.exp %169 : vector<8x32xf32>
    %cst_128 = arith.constant 1.000000e+00 : f32
    %171 = vector.broadcast %cst_128 : f32 to vector<8x32xf32>
    %172 = arith.addf %171, %170 : vector<8x32xf32>
    %173 = arith.divf %171, %172 : vector<8x32xf32>
    %174 = arith.mulf %168, %173 : vector<8x32xf32>
    %175 = arith.truncf %174 : vector<8x32xf32> to vector<8x32xbf16>
    %c4_129 = arith.constant 4 : index
    %c0_130 = arith.constant 0 : index
    %c0_131 = arith.constant 0 : index
    %176 = vector.load %arg6[%c4_129, %c0_130, %c0_131] : memref<6x16x8xbf16, #tpu.memory_space<vmem>>, vector<1x16x8xbf16>
    %177 = vector.shape_cast %176 : vector<1x16x8xbf16> to vector<16x8xbf16>
    %cst_132 = arith.constant dense<0.000000e+00> : vector<16x32xf32>
    %178 = tpu.matmul %177, %175, %cst_132 {dimension_numbers = #tpu.dot_dimension_numbers<[1], [0], [0], [1], [0, 0, 1, 1], [], []>} : vector<16x8xbf16>, vector<8x32xbf16>, vector<16x32xf32> -> vector<16x32xf32>
    %179 = arith.addf %142, %178 : vector<16x32xf32>
    %c4_133 = arith.constant 4 : index
    %c0_134 = arith.constant 0 : index
    %c0_135 = arith.constant 0 : index
    %180 = vector.load %arg7[%c4_133, %c0_134, %c0_135] : memref<6x8x8xbf16, #tpu.memory_space<vmem>>, vector<1x8x8xbf16>
    %181 = vector.shape_cast %180 : vector<1x8x8xbf16> to vector<8x8xbf16>
    %cst_136 = arith.constant dense<0.000000e+00> : vector<8x32xf32>
    %182 = tpu.matmul %181, %175, %cst_136 {dimension_numbers = #tpu.dot_dimension_numbers<[1], [0], [0], [1], [0, 0, 1, 1], [], []>} : vector<8x8xbf16>, vector<8x32xbf16>, vector<8x32xf32> -> vector<8x32xf32>
    %c4_137 = arith.constant 4 : index
    %c0_138 = arith.constant 0 : index
    %c0_139 = arith.constant 0 : index
    %183 = vector.load %arg8[%c4_137, %c0_138, %c0_139] : memref<6x8x1xf32, #tpu.memory_space<vmem>>, vector<1x8x1xf32>
    %184 = vector.shape_cast %183 : vector<1x8x1xf32> to vector<8x1xf32>
    %185 = vector.broadcast %184 : vector<8x1xf32> to vector<8x32xf32>
    %186 = arith.addf %182, %185 : vector<8x32xf32>
    %187 = arith.addf %186, %150 : vector<8x32xf32>
    %188 = arith.truncf %187 : vector<8x32xf32> to vector<8x32xbf16>
    %c4_i32_140 = arith.constant 4 : i32
    %189 = tpu.dynamic_rotate %187 by %c4_i32_140 dim 1 : vector<8x32xf32>, i32 -> vector<8x32xf32>
    %190 = arith.truncf %189 : vector<8x32xf32> to vector<8x32xbf16>
    %c5 = arith.constant 5 : index
    %c0_141 = arith.constant 0 : index
    %c0_142 = arith.constant 0 : index
    %191 = vector.load %arg2[%c5, %c0_141, %c0_142] : memref<6x8x8xbf16, #tpu.memory_space<vmem>>, vector<1x8x8xbf16>
    %192 = vector.shape_cast %191 : vector<1x8x8xbf16> to vector<8x8xbf16>
    %cst_143 = arith.constant dense<0.000000e+00> : vector<8x32xf32>
    %193 = tpu.matmul %192, %190, %cst_143 {dimension_numbers = #tpu.dot_dimension_numbers<[1], [0], [0], [1], [0, 0, 1, 1], [], []>} : vector<8x8xbf16>, vector<8x32xbf16>, vector<8x32xf32> -> vector<8x32xf32>
    %c5_144 = arith.constant 5 : index
    %c0_145 = arith.constant 0 : index
    %c0_146 = arith.constant 0 : index
    %194 = vector.load %arg3[%c5_144, %c0_145, %c0_146] : memref<6x8x8xbf16, #tpu.memory_space<vmem>>, vector<1x8x8xbf16>
    %195 = vector.shape_cast %194 : vector<1x8x8xbf16> to vector<8x8xbf16>
    %cst_147 = arith.constant dense<0.000000e+00> : vector<8x32xf32>
    %196 = tpu.matmul %195, %188, %cst_147 {dimension_numbers = #tpu.dot_dimension_numbers<[1], [0], [0], [1], [0, 0, 1, 1], [], []>} : vector<8x8xbf16>, vector<8x32xbf16>, vector<8x32xf32> -> vector<8x32xf32>
    %197 = arith.addf %193, %196 : vector<8x32xf32>
    %c5_148 = arith.constant 5 : index
    %c0_149 = arith.constant 0 : index
    %c0_150 = arith.constant 0 : index
    %198 = vector.load %arg4[%c5_148, %c0_149, %c0_150] : memref<6x8x8xbf16, #tpu.memory_space<vmem>>, vector<1x8x8xbf16>
    %199 = vector.shape_cast %198 : vector<1x8x8xbf16> to vector<8x8xbf16>
    %cst_151 = arith.constant dense<0.000000e+00> : vector<8x32xf32>
    %200 = tpu.matmul %199, %190, %cst_151 {dimension_numbers = #tpu.dot_dimension_numbers<[1], [0], [0], [1], [0, 0, 1, 1], [], []>} : vector<8x8xbf16>, vector<8x32xbf16>, vector<8x32xf32> -> vector<8x32xf32>
    %c5_152 = arith.constant 5 : index
    %c0_153 = arith.constant 0 : index
    %c0_154 = arith.constant 0 : index
    %201 = vector.load %arg5[%c5_152, %c0_153, %c0_154] : memref<6x8x8xbf16, #tpu.memory_space<vmem>>, vector<1x8x8xbf16>
    %202 = vector.shape_cast %201 : vector<1x8x8xbf16> to vector<8x8xbf16>
    %cst_155 = arith.constant dense<0.000000e+00> : vector<8x32xf32>
    %203 = tpu.matmul %202, %188, %cst_155 {dimension_numbers = #tpu.dot_dimension_numbers<[1], [0], [0], [1], [0, 0, 1, 1], [], []>} : vector<8x8xbf16>, vector<8x32xbf16>, vector<8x32xf32> -> vector<8x32xf32>
    %204 = arith.addf %200, %203 : vector<8x32xf32>
    %205 = math.tanh %197 : vector<8x32xf32>
    %206 = arith.negf %204 : vector<8x32xf32>
    %207 = math.exp %206 : vector<8x32xf32>
    %cst_156 = arith.constant 1.000000e+00 : f32
    %208 = vector.broadcast %cst_156 : f32 to vector<8x32xf32>
    %209 = arith.addf %208, %207 : vector<8x32xf32>
    %210 = arith.divf %208, %209 : vector<8x32xf32>
    %211 = arith.mulf %205, %210 : vector<8x32xf32>
    %212 = arith.truncf %211 : vector<8x32xf32> to vector<8x32xbf16>
    %c5_157 = arith.constant 5 : index
    %c0_158 = arith.constant 0 : index
    %c0_159 = arith.constant 0 : index
    %213 = vector.load %arg6[%c5_157, %c0_158, %c0_159] : memref<6x16x8xbf16, #tpu.memory_space<vmem>>, vector<1x16x8xbf16>
    %214 = vector.shape_cast %213 : vector<1x16x8xbf16> to vector<16x8xbf16>
    %cst_160 = arith.constant dense<0.000000e+00> : vector<16x32xf32>
    %215 = tpu.matmul %214, %212, %cst_160 {dimension_numbers = #tpu.dot_dimension_numbers<[1], [0], [0], [1], [0, 0, 1, 1], [], []>} : vector<16x8xbf16>, vector<8x32xbf16>, vector<16x32xf32> -> vector<16x32xf32>
    %216 = arith.addf %179, %215 : vector<16x32xf32>
    %217 = tpu.transpose %216, [1, 0] : vector<16x32xf32> -> vector<32x16xf32>
    %c0_161 = arith.constant 0 : index
    %c0_162 = arith.constant 0 : index
    %218 = vector.load %arg9[%c0_161, %c0_162] : memref<1x16xf32, #tpu.memory_space<vmem>>, vector<1x16xf32>
    %219 = vector.broadcast %218 : vector<1x16xf32> to vector<32x16xf32>
    %220 = arith.addf %217, %219 : vector<32x16xf32>
    %cst_163 = arith.constant 0.000000e+00 : f32
    %221 = vector.broadcast %cst_163 : f32 to vector<32x16xf32>
    %222 = arith.maximumf %220, %221 : vector<32x16xf32>
    %223 = arith.truncf %222 : vector<32x16xf32> to vector<32x16xbf16>
    %c0_164 = arith.constant 0 : index
    %c0_165 = arith.constant 0 : index
    %224 = vector.load %arg10[%c0_164, %c0_165] : memref<16x16xbf16, #tpu.memory_space<vmem>>, vector<16x16xbf16>
    %cst_166 = arith.constant dense<0.000000e+00> : vector<32x16xf32>
    %225 = tpu.matmul %223, %224, %cst_166 {dimension_numbers = #tpu.dot_dimension_numbers<[1], [0], [0], [1], [0, 0, 1, 1], [], []>} : vector<32x16xbf16>, vector<16x16xbf16>, vector<32x16xf32> -> vector<32x16xf32>
    %c0_167 = arith.constant 0 : index
    %c0_168 = arith.constant 0 : index
    %226 = vector.load %arg11[%c0_167, %c0_168] : memref<1x16xf32, #tpu.memory_space<vmem>>, vector<1x16xf32>
    %227 = vector.broadcast %226 : vector<1x16xf32> to vector<32x16xf32>
    %228 = arith.addf %225, %227 : vector<32x16xf32>
    %cst_169 = arith.constant 0.000000e+00 : f32
    %229 = vector.broadcast %cst_169 : f32 to vector<32x16xf32>
    %230 = arith.maximumf %228, %229 : vector<32x16xf32>
    %231 = arith.truncf %230 : vector<32x16xf32> to vector<32x16xbf16>
    %c0_170 = arith.constant 0 : index
    %c0_171 = arith.constant 0 : index
    %232 = vector.load %arg12[%c0_170, %c0_171] : memref<16x128xbf16, #tpu.memory_space<vmem>>, vector<16x128xbf16>
    %cst_172 = arith.constant dense<0.000000e+00> : vector<32x128xf32>
    %233 = tpu.matmul %231, %232, %cst_172 {dimension_numbers = #tpu.dot_dimension_numbers<[1], [0], [0], [1], [0, 0, 1, 1], [], []>} : vector<32x16xbf16>, vector<16x128xbf16>, vector<32x128xf32> -> vector<32x128xf32>
    %c0_173 = arith.constant 0 : index
    %c0_174 = arith.constant 0 : index
    %234 = vector.load %arg13[%c0_173, %c0_174] : memref<1x128xf32, #tpu.memory_space<vmem>>, vector<1x128xf32>
    %235 = vector.broadcast %234 : vector<1x128xf32> to vector<32x128xf32>
    %236 = arith.addf %233, %235 : vector<32x128xf32>
    %c0_175 = arith.constant 0 : index
    %c0_176 = arith.constant 0 : index
    %c0_177 = arith.constant 0 : index
    %237 = vector.load %arg14[%c0_175, %c0_176, %c0_177] : memref<1x32x128xf32, #tpu.memory_space<vmem>>, vector<1x32x128xf32>
    %238 = vector.shape_cast %237 : vector<1x32x128xf32> to vector<32x128xf32>
    %239 = vector.shape_cast %236 : vector<32x128xf32> to vector<1x32x128xf32>
    tpu.vector_store %arg14[%c0_175, %c0_176, %c0_177], %239 {strides = array<i32>} : memref<1x32x128xf32, #tpu.memory_space<vmem>>, vector<1x32x128xf32>,
    return
  }
  func.func @transform_0(%arg0: i32) -> (i32, i32, i32) {
    %c0_i32 = arith.constant 0 : i32
    %c0_i32_0 = arith.constant 0 : i32
    %c0_i32_1 = arith.constant 0 : i32
    return %arg0, %c0_i32, %c0_i32_0 : i32, i32, i32
  }
  func.func @transform_1(%arg0: i32) -> (i32, i32, i32) {
    %c0_i32 = arith.constant 0 : i32
    %c0_i32_0 = arith.constant 0 : i32
    %c0_i32_1 = arith.constant 0 : i32
    %c0_i32_2 = arith.constant 0 : i32
    return %c0_i32, %c0_i32_0, %c0_i32_1 : i32, i32, i32
  }
  func.func @transform_2(%arg0: i32) -> (i32, i32, i32) {
    %c0_i32 = arith.constant 0 : i32
    %c0_i32_0 = arith.constant 0 : i32
    %c0_i32_1 = arith.constant 0 : i32
    %c0_i32_2 = arith.constant 0 : i32
    return %c0_i32, %c0_i32_0, %c0_i32_1 : i32, i32, i32
  }
  func.func @transform_3(%arg0: i32) -> (i32, i32, i32) {
    %c0_i32 = arith.constant 0 : i32
    %c0_i32_0 = arith.constant 0 : i32
    %c0_i32_1 = arith.constant 0 : i32
    %c0_i32_2 = arith.constant 0 : i32
    return %c0_i32, %c0_i32_0, %c0_i32_1 : i32, i32, i32
  }
  func.func @transform_4(%arg0: i32) -> (i32, i32, i32) {
    %c0_i32 = arith.constant 0 : i32
    %c0_i32_0 = arith.constant 0 : i32
    %c0_i32_1 = arith.constant 0 : i32
    %c0_i32_2 = arith.constant 0 : i32
    return %c0_i32, %c0_i32_0, %c0_i32_1 : i32, i32, i32
  }
  func.func @transform_5(%arg0: i32) -> (i32, i32, i32) {
    %c0_i32 = arith.constant 0 : i32
    %c0_i32_0 = arith.constant 0 : i32
    %c0_i32_1 = arith.constant 0 : i32
    %c0_i32_2 = arith.constant 0 : i32
    return %c0_i32, %c0_i32_0, %c0_i32_1 : i32, i32, i32
  }
  func.func @transform_6(%arg0: i32) -> (i32, i32, i32) {
    %c0_i32 = arith.constant 0 : i32
    %c0_i32_0 = arith.constant 0 : i32
    %c0_i32_1 = arith.constant 0 : i32
    %c0_i32_2 = arith.constant 0 : i32
    return %c0_i32, %c0_i32_0, %c0_i32_1 : i32, i32, i32
  }
  func.func @transform_7(%arg0: i32) -> (i32, i32, i32) {
    %c0_i32 = arith.constant 0 : i32
    %c0_i32_0 = arith.constant 0 : i32
    %c0_i32_1 = arith.constant 0 : i32
    %c0_i32_2 = arith.constant 0 : i32
    return %c0_i32, %c0_i32_0, %c0_i32_1 : i32, i32, i32
  }
  func.func @transform_8(%arg0: i32) -> (i32, i32) {
    %c0_i32 = arith.constant 0 : i32
    %c0_i32_0 = arith.constant 0 : i32
    %c0_i32_1 = arith.constant 0 : i32
    return %c0_i32, %c0_i32_0 : i32, i32
  }
  func.func @transform_9(%arg0: i32) -> (i32, i32) {
    %c0_i32 = arith.constant 0 : i32
    %c0_i32_0 = arith.constant 0 : i32
    %c0_i32_1 = arith.constant 0 : i32
    return %c0_i32, %c0_i32_0 : i32, i32
  }
  func.func @transform_10(%arg0: i32) -> (i32, i32) {
    %c0_i32 = arith.constant 0 : i32
    %c0_i32_0 = arith.constant 0 : i32
    %c0_i32_1 = arith.constant 0 : i32
    return %c0_i32, %c0_i32_0 : i32, i32
  }
  func.func @transform_11(%arg0: i32) -> (i32, i32) {
    %c0_i32 = arith.constant 0 : i32
    %c0_i32_0 = arith.constant 0 : i32
    %c0_i32_1 = arith.constant 0 : i32
    return %c0_i32, %c0_i32_0 : i32, i32
  }
  func.func @transform_12(%arg0: i32) -> (i32, i32) {
    %c0_i32 = arith.constant 0 : i32
    %c0_i32_0 = arith.constant 0 : i32
    %c0_i32_1 = arith.constant 0 : i32
    return %c0_i32, %c0_i32_0 : i32, i32
  }
  func.func @transform_13(%arg0: i32) -> (i32, i32, i32) {
    %c0_i32 = arith.constant 0 : i32
    %c0_i32_0 = arith.constant 0 : i32
    %c0_i32_1 = arith.constant 0 : i32
    return %arg0, %c0_i32, %c0_i32_0 : i32, i32, i32
  }
}

</mosaic_0001>

<bundles_post_ra>
// kernel: wavenet_forward.1
= control target key start
LH: loop header
LB: loop body
LE: loop exit
PB: predicated region body
PF: predicated region fallthrough
CT: control target
= control target key end

     0   :  { %s3079_s25 = smov 0   ;;  %s3497_s0 = inlined_call_operand.vmem [shape: f32[2,8,32], index: 0, kind: input, shape index: {}]   ;;  %s3498_s1 = inlined_call_operand.vmem [shape: bf16[6,8,8], index: 1, kind: input, shape index: {}]   ;;  %s3499_s2 = inlined_call_operand.vmem [shape: bf16[6,8,8], index: 2, kind: input, shape index: {}]   ;;  %s3500_s3 = inlined_call_operand.vmem [shape: bf16[6,8,8], index: 3, kind: input, shape index: {}]   ;;  %s3501_s4 = inlined_call_operand.vmem [shape: bf16[6,8,8], index: 4, kind: input, shape index: {}]   ;;  %s3502_s5 = inlined_call_operand.vmem [shape: bf16[6,16,8], index: 5, kind: input, shape index: {}]   ;;  %s3503_s6 = inlined_call_operand.vmem [shape: bf16[6,8,8], index: 6, kind: input, shape index: {}]   ;;  %s3504_s7 = inlined_call_operand.vmem [shape: f32[6,8,1], index: 7, kind: input, shape index: {}]   ;;  %s3505_s8 = inlined_call_operand.vmem [shape: f32[1,16], index: 8, kind: input, shape index: {}]   ;;  %s3506_s9 = inlined_call_operand.vmem [shape: bf16[16,16], index: 9, kind: input, shape index: {}]   ;;  %s3507_s10 = inlined_call_operand.vmem [shape: f32[1,16], index: 10, kind: input, shape index: {}]   ;;  %s3508_s11 = inlined_call_operand.vmem [shape: bf16[16,128], index: 11, kind: input, shape index: {}]   ;;  %s3509_s12 = inlined_call_operand.vmem [shape: f32[1,128], index: 12, kind: input, shape index: {}]   ;;  %s3510_s13 = inlined_call_operand.vmem [shape: f32[2,32,128], index: 13, kind: output, shape index: {}]  }
   0x1 LB: > { %s2530_s26 = sadd.s32 4294967295, %s3000_s25   ;;  %p2534_p0 = scmp.ge.s32.totalorder %s3000_s25, 1  ;;  %s3000_s25 = sphi %s3079_s25, %s23_s25  }
   0x2   : > { %p386_p1 = scmp.lt.s32.totalorder %s3000_s25, 3 }
   0x4   : > { %p387_p2 = pnand %p2534_p0, %p386_p1 }
   0x5   : > { %p429_p3 = scmp.lt.s32.totalorder (!%p387_p2), %s2530_s26, 1  ;;  %s3002_s14 = smov (!%p387_p2), 32  }
   0x6   : > { %390 = sbr.rel (%p387_p2) target bundleno = 5330 (0x14d2), region = 72  ;;  %s3005_s19 = smov (!%p387_p2), 97  }
   0x7   : > { %s3007_s21 = smov (!%p387_p2), 98   ;;  %s3008_s28 = smov (!%p387_p2), 100  }
   0xb   : > { %s3512_s26 = smov (!%p429_p3, %s2530_s26), 1  ;;  %vm455_vm0 = vcmask 1043456   ;;  %v3003_v2 = vmov 0.0   ;;  %vm3004_vm1 = vmmov 0   ;;  %v450_v4 = vld [vmem:[%s3499_s2] sm:$0xf] }
   0xc   : > { %s2535_s27 = sshll.u32 %s3512_s26, 3  ;;  %2711 = vmatprep.subr.bf16.mxu0 %v3003_v2  ;;  %2713 = vmatprep.mubr.msk.bf16.mxu0 %vm3004_vm1, %v3003_v2  ;;  %vm451_vm2 = vcmask 64512   ;;  %vm441_vm3 = vcmask 1047808   ;;  %v549_v7 = vld [vmem:[%s3501_s4] sm:$0xf]  ;;  %v3006_v24 = vmov 0  }
   0xd   : > { %s432_s30 = scalar_lea.vmem %s3497_s0, %s2535_s27  ;;  %2717 = vmatprep.subr.bf16.mxu1 %v3003_v2  ;;  %2719 = vmatprep.mubr.msk.bf16.mxu1 %vm3004_vm1, %v3003_v2  ;;  %v449_v17 = vld [vmem:[%s3498_s1] sm:$0xf]  ;;  %v2545_v53 = vld [vmem:[%s3499_s2 + $0x4] sm:$0xf]  ;;  %v2560_v56 = vld [vmem:[%s3504_s7 + $0x8] sm:$0xff]  ;;  %vm2339_vm4 = vcmask 130048  }
   0xe   : > { %v3093_v0 = vld [vmem:[%s432_s30] sm:$0xff]  ;;  %2948 = vset.pattern.permute.xlu1 %v3006_v24  ;;  %2949 = vset.pattern.permute.xlu0 %v3006_v24  ;;  %s2634_s16 = sshll.u32 %s3512_s26, 5 }
   0xf   : > { %442 = vrot.lane.b32.xlu0 %v3093_v0, %s3002_s14  ;;  %v440_v1 = vpack.c.bf16 %v3093_v0, %v3093_v0  ;;  %v548_v18 = vld [vmem:[%s3500_s3] sm:$0xf]  ;;  %v2549_v57 = vld [vmem:[%s3501_s4 + $0x4] sm:$0xf]  ;;  %s437_s18 = scalar_lea.vmem %s3510_s13, %s2634_s16 }
  0x10   : > { %v648_v23 = vld [vmem:[%s3504_s7] sm:$0xff] }
  0x11   : > { %v457_v3 = vsel %vm455_vm0, %v440_v1, 0  ;;  %v647_v43 = vld [vmem:[%s3503_s6] sm:$0xf] }
  0x12   : > { %2712 = vmatpush3.bf16.msra.mxu0 %v457_v3 }
  0x13   : > { %2723 = vmatprep.subr.bf16.mxu0 %v3003_v2 }
  0x15   : > { %2714 = vmatmul.mubr.msk.bf16.vlgmr.msra.gmra.mxu0 %vm451_vm2, %v450_v4  ;;  %v2544_v4 = vld [vmem:[%s3498_s1 + $0x4] sm:$0xf] }
  0x16   : > { %2724 = vmatpush3.bf16.msra.mxu0 %v457_v3  ;;  %2725 = vmatprep.mubr.msk.bf16.mxu0 %vm3004_vm1, %v3003_v2 }
  0x17   : > { %2735 = vmatprep.subr.bf16.mxu0 %v3003_v2 }
  0x1d   : > { %2726 = vmatmul.mubr.msk.bf16.vlgmr.msra.gmra.mxu0 %vm451_vm2, %v549_v7 }
  0x1e   : > { %2737 = vmatprep.mubr.msk.bf16.mxu0 %vm3004_vm1, %v3003_v2 }
  0x81   : > { %v443_v5 = vpop.permute.xlu0 %442 }
  0x82   : > { %v444_v6 = vsel %vm441_vm3, %v443_v5, %v3093_v0  ;;  %v2548_v5 = vld [vmem:[%s3500_s3 + $0x4] sm:$0xf] }
  0x83   : > { %445 = vrot.lane.b32.xlu0 %v444_v6, %s3002_s14 }
  0xd5   : > { %v493_v11 = vpop.f32.mrf.mxu0 }
  0xd7   : > { %v2715_v12 = vpop.f32.mrf.mxu0 }
  0xd9   : > { %v496_v13 = vpop.f32.mrf.mxu0 }
  0xdb   : > { %v2716_v14 = vpop.f32.mrf.mxu0 }
  0xdd   : > { %v587_v19 = vpop.f32.mrf.mxu0 }
  0xdf   : > { %v2727_v20 = vpop.f32.mrf.mxu0 }
  0xe1   : > { %v590_v21 = vpop.f32.mrf.mxu0 }
  0xe3   : > { %v2728_v22 = vpop.f32.mrf.mxu0 }
  0xf5   : > { %v446_v8 = vpop.permute.xlu0 %445 }
  0xf6   : > { %v447_v9 = vsel %vm441_vm3, %v446_v8, %v3093_v0 }
  0xf7   : > { %v448_v10 = vpack.c.bf16 %v447_v9, %v447_v9 }
  0xf9   : > { %500 = vrot.lane.b32.xlu1 %v448_v10, %s3005_s19  ;;  %v2951_v10 = vld [vmem:[%s3502_s5] sm:$0xff]  }
  0xfd   : > { %651 = vperm.xlu1 %2948, %v648_v23  }
 0x16b   : > { %v501_v15 = vpop.permute.xlu1 %500 }
 0x16c   : > { %v506_v16 = vsel %vm455_vm0, %v501_v15, 0 }
 0x16d   : > { %2718 = vmatpush3.bf16.msra.mxu1 %v506_v16 }
 0x16e   : > { %2729 = vmatprep.subr.bf16.mxu1 %v3003_v2 }
 0x170   : > { %2720 = vmatmul.mubr.msk.bf16.vlgmr.msra.gmra.mxu1 %vm451_vm2, %v449_v17 }
 0x171   : > { %2730 = vmatpush3.bf16.msra.mxu1 %v506_v16  ;;  %2731 = vmatprep.mubr.msk.bf16.mxu1 %vm3004_vm1, %v3003_v2 }
 0x172   : > { %2741 = vmatprep.subr.bf16.mxu1 %v3003_v2 }
 0x178   : > { %2732 = vmatmul.mubr.msk.bf16.vlgmr.msra.gmra.mxu1 %vm451_vm2, %v548_v18  ;;  %v652_v44 = vpop.permute.xlu1 %651 }
 0x179   : > { %2743 = vmatprep.mubr.msk.bf16.mxu1 %vm3004_vm1, %v3003_v2 }
 0x230   : > { %v542_v25 = vpop.f32.mrf.mxu1 }
 0x231   : > { %v543_v35 = vadd.f32 %v542_v25, %v493_v11 }
 0x232   : > { %v2721_v26 = vpop.f32.mrf.mxu1 }
 0x234   : > { %v545_v27 = vpop.f32.mrf.mxu1 }
 0x236   : > { %v2722_v28 = vpop.f32.mrf.mxu1 }
 0x238   : > { %v630_v29 = vpop.f32.mrf.mxu1 }
 0x239   : > { %v631_v30 = vadd.f32 %v630_v29, %v587_v19  ;;  %v2950_v29 = vld [vmem:[%s3502_s5 + $0x8] sm:$0xff]  }
 0x23a   : > { %v2733_v31 = vpop.f32.mrf.mxu1 }
 0x23b   : > { %v2542_v32 = vmul.f32 -1.442695, %v631_v30  ;;  %v2559_v30 = vld [vmem:[%s3503_s6 + $0x4] sm:$0xf] }
 0x23c   : > { %v633_v33 = vpop.f32.mrf.mxu1 }
 0x23d   : > { %2958 = vpow2.f32 %v2542_v32 }
 0x23e   : > { %v2734_v34 = vpop.f32.mrf.mxu1  ;;  %2960 = vtanh.f32 %v543_v35 }
 0x24a   : > { %v2959_v36 = vpop.eup %2958 }
 0x24b   : > { %v640_v37 = vadd.f32 1.0, %v2959_v36  ;;  %v2961_v38 = vpop.eup %2960 }
 0x24d   : > { %2962 = vrcp.f32 %v640_v37 }
 0x25a   : > { %v2963_v39 = vpop.eup %2962 }
 0x25b   : > { %v643_v40 = vmul.f32 %v2963_v39, %v2961_v38 }
 0x25d   : > { %v644_v41 = vpack.c.bf16 %v643_v40, %v643_v40 }
 0x25f   : > { %v658_v42 = vsel %vm455_vm0, %v644_v41, 0 }
 0x260   : > { %2736 = vmatpush3.bf16.msra.mxu0 %v658_v42 }
 0x261   : > { %2747 = vmatprep.subr.bf16.mxu0 %v3003_v2 }
 0x263   : > { %2738 = vmatmul.mubr.msk.bf16.vlgmr.msra.gmra.mxu0 %vm451_vm2, %v647_v43 }
 0x264   : > { %2749 = vmatprep.mubr.msk.bf16.mxu0 %vm3004_vm1, %v3003_v2 }
 0x323   : > { %v694_v45 = vpop.f32.mrf.mxu0 }
 0x324   : > { %v695_v46 = vadd.f32 %v694_v45, %v652_v44 }
 0x325   : > { %v2739_v47 = vpop.f32.mrf.mxu0 }
 0x326   : > { %v3153_v48 = vadd.f32 %v695_v46, %v3093_v0 }
 0x327   : > { %v697_v49 = vpop.f32.mrf.mxu0 }
 0x328   : > { %702 = vrot.lane.b32.xlu0 %v3153_v48, %s3002_s14  ;;  %v701_v50 = vpack.c.bf16 %v3153_v48, %v3153_v48  ;;  %v2563_v49 = vld [vmem:[%s3499_s2 + $0x8] sm:$0xf] }
 0x329   : > { %v2740_v51 = vpop.f32.mrf.mxu0 }
 0x32a   : > { %v717_v52 = vsel %vm455_vm0, %v701_v50, 0  ;;  %v2576_v51 = vld [vmem:[%s3504_s7 + $0x10] sm:$0xff] }
 0x32b   : > { %2742 = vmatpush3.bf16.msra.mxu1 %v717_v52 }
 0x32c   : > { %2753 = vmatprep.subr.bf16.mxu1 %v3003_v2 }
 0x32e   : > { %2744 = vmatmul.mubr.msk.bf16.vlgmr.msra.gmra.mxu1 %vm451_vm2, %v2545_v53 }
 0x32f   : > { %2754 = vmatpush3.bf16.msra.mxu1 %v717_v52  ;;  %2755 = vmatprep.mubr.msk.bf16.mxu1 %vm3004_vm1, %v3003_v2  ;;  %v2567_v52 = vld [vmem:[%s3501_s4 + $0x8] sm:$0xf] }
 0x330   : > { %2765 = vmatprep.subr.bf16.mxu1 %v3003_v2 }
 0x336   : > { %2756 = vmatmul.mubr.msk.bf16.vlgmr.msra.gmra.mxu1 %vm451_vm2, %v2549_v57 }
 0x337   : > { %2767 = vmatprep.mubr.msk.bf16.mxu1 %vm3004_vm1, %v3003_v2 }
 0x39a   : > { %v703_v54 = vpop.permute.xlu0 %702 }
 0x39b   : > { %v704_v55 = vsel %vm441_vm3, %v703_v54, %v3153_v48 }
 0x39c   : > { %705 = vrot.lane.b32.xlu1 %v704_v55, %s3002_s14 }
 0x3a0   : > { %1017 = vperm.xlu1 %2948, %v2560_v56  }
 0x3ee   : > { %v753_v61 = vpop.f32.mrf.mxu1 }
 0x3f0   : > { %v2745_v62 = vpop.f32.mrf.mxu1 }
 0x3f1   : > { %v2562_v62 = vld [vmem:[%s3498_s1 + $0x8] sm:$0xf] }
 0x3f2   : > { %v756_v63 = vpop.f32.mrf.mxu1 }
 0x3f3   : > { %v2566_v63 = vld [vmem:[%s3500_s3 + $0x8] sm:$0xf] }
 0x3f4   : > { %v2746_v0 = vpop.f32.mrf.mxu1 }
 0x3f6   : > { %v849_v6 = vpop.f32.mrf.mxu1 }
 0x3f8   : > { %v2757_v7 = vpop.f32.mrf.mxu1 }
 0x3fa   : > { %v852_v8 = vpop.f32.mrf.mxu1 }
 0x3fc   : > { %v2758_v9 = vpop.f32.mrf.mxu1 }
 0x40e   : > { %v706_v58 = vpop.permute.xlu1 %705 }
 0x40f   : > { %v707_v59 = vsel %vm441_vm3, %v706_v58, %v3153_v48 }
 0x410   : > { %v708_v60 = vpack.c.bf16 %v707_v59, %v707_v59 }
 0x412   : > { %760 = vrot.lane.b32.xlu0 %v708_v60, %s3007_s21 }
 0x41b   : > { %v1018_v39 = vpop.permute.xlu1 %1017 }
 0x484   : > { %v761_v1 = vpop.permute.xlu0 %760 }
 0x485   : > { %v766_v3 = vsel %vm455_vm0, %v761_v1, 0 }
 0x486   : > { %2748 = vmatpush3.bf16.msra.mxu0 %v766_v3 }
 0x487   : > { %2759 = vmatprep.subr.bf16.mxu0 %v3003_v2 }
 0x489   : > { %2750 = vmatmul.mubr.msk.bf16.vlgmr.msra.gmra.mxu0 %vm451_vm2, %v2544_v4 }
 0x48a   : > { %2760 = vmatpush3.bf16.msra.mxu0 %v766_v3  ;;  %2761 = vmatprep.mubr.msk.bf16.mxu0 %vm3004_vm1, %v3003_v2 }
 0x48b   : > { %2771 = vmatprep.subr.bf16.mxu0 %v3003_v2 }
 0x491   : > { %2762 = vmatmul.mubr.msk.bf16.vlgmr.msra.gmra.mxu0 %vm451_vm2, %v2548_v5 }
 0x492   : > { %2772 = vmatpush3.bf16.msra.mxu0 %v658_v42  ;;  %2773 = vmatprep.mubr.msk.bf16.mxu0 %vm3004_vm1, %v3003_v2 }
 0x493   : > { %2783 = vmatprep.subr.bf16.mxu0 %v3003_v2 }
 0x499   : > { %2774 = vmatmul.mubr.msk.bf16.vlgmr.msra.gmra.mxu0 %vm451_vm2, %v2951_v10 }
 0x49a   : > { %2785 = vmatprep.mubr.msk.bf16.mxu0 %vm3004_vm1, %v3003_v2 }
 0x549   : > { %v802_v11 = vpop.f32.mrf.mxu0 }
 0x54a   : > { %v803_v21 = vadd.f32 %v802_v11, %v753_v61 }
 0x54b   : > { %v2751_v12 = vpop.f32.mrf.mxu0 }
 0x54d   : > { %v805_v13 = vpop.f32.mrf.mxu0 }
 0x54f   : > { %v2752_v14 = vpop.f32.mrf.mxu0 }
 0x551   : > { %v892_v15 = vpop.f32.mrf.mxu0 }
 0x552   : > { %v893_v16 = vadd.f32 %v892_v15, %v849_v6 }
 0x553   : > { %v2763_v17 = vpop.f32.mrf.mxu0 }
 0x554   : > { %v2552_v18 = vmul.f32 -1.442695, %v893_v16 }
 0x555   : > { %v895_v19 = vpop.f32.mrf.mxu0 }
 0x556   : > { %2964 = vpow2.f32 %v2552_v18 }
 0x557   : > { %v2764_v20 = vpop.f32.mrf.mxu0  ;;  %2966 = vtanh.f32 %v803_v21 }
 0x559   : > { %v3220_v31 = vpop.f32.mrf.mxu0 }
 0x55b   : > { %v2775_v32 = vpop.f32.mrf.mxu0 }
 0x55d   : > { %v3222_v33 = vpop.f32.mrf.mxu0 }
 0x55f   : > { %v2776_v34 = vpop.f32.mrf.mxu0 }
 0x563   : > { %v2965_v22 = vpop.eup %2964 }
 0x564   : > { %v902_v23 = vadd.f32 1.0, %v2965_v22  ;;  %v2967_v24 = vpop.eup %2966 }
 0x566   : > { %2968 = vrcp.f32 %v902_v23  ;;  %v2952_v23 = vld [vmem:[%s3502_s5 + $0x10] sm:$0xff]  }
 0x573   : > { %v2969_v25 = vpop.eup %2968 }
 0x574   : > { %v905_v26 = vmul.f32 %v2969_v25, %v2967_v24  ;;  %v2575_v24 = vld [vmem:[%s3503_s6 + $0x8] sm:$0xf] }
 0x576   : > { %v906_v27 = vpack.c.bf16 %v905_v26, %v905_v26 }
 0x578   : > { %v919_v28 = vsel %vm455_vm0, %v906_v27, 0 }
 0x579   : > { %2766 = vmatpush3.bf16.msra.mxu1 %v919_v28 }
 0x57a   : > { %2777 = vmatprep.subr.bf16.mxu1 %v3003_v2 }
 0x57c   : > { %2768 = vmatmul.mubr.msk.bf16.vlgmr.msra.gmra.mxu1 %vm451_vm2, %v2950_v29 }
 0x57d   : > { %2778 = vmatpush3.bf16.msra.mxu1 %v919_v28  ;;  %2779 = vmatprep.mubr.msk.bf16.mxu1 %vm3004_vm1, %v3003_v2 }
 0x57e   : > { %2789 = vmatprep.subr.bf16.mxu1 %v3003_v2 }
 0x584   : > { %2780 = vmatmul.mubr.msk.bf16.vlgmr.msra.gmra.mxu1 %vm451_vm2, %v2559_v30 }
 0x585   : > { %2791 = vmatprep.mubr.msk.bf16.mxu1 %vm3004_vm1, %v3003_v2 }
 0x63c   : > { %v3224_v35 = vpop.f32.mrf.mxu1 }
 0x63d   : > { %v1005_v25 = vadd.f32 %v3220_v31, %v3224_v35 }
 0x63e   : > { %v2769_v36 = vpop.f32.mrf.mxu1 }
 0x640   : > { %v3226_v37 = vpop.f32.mrf.mxu1 }
 0x641   : > { %v1008_v36 = vadd.f32 %v3222_v33, %v3226_v37  ;;  %v2579_v33 = vld [vmem:[%s3499_s2 + $0xc] sm:$0xf] }
 0x642   : > { %v2770_v38 = vpop.f32.mrf.mxu1 }
 0x644   : > { %v1057_v40 = vpop.f32.mrf.mxu1 }
 0x645   : > { %v1058_v41 = vadd.f32 %v1057_v40, %v1018_v39 }
 0x646   : > { %v2781_v42 = vpop.f32.mrf.mxu1 }
 0x647   : > { %v3229_v43 = vadd.f32 %v1058_v41, %v3153_v48 }
 0x648   : > { %v1060_v44 = vpop.f32.mrf.mxu1 }
 0x649   : > { %1065 = vrot.lane.b32.xlu0 %v3229_v43, %s3002_s14  ;;  %v1064_v45 = vpack.c.bf16 %v3229_v43, %v3229_v43 }
 0x64a   : > { %v2782_v46 = vpop.f32.mrf.mxu1 }
 0x64b   : > { %v1080_v47 = vsel %vm455_vm0, %v1064_v45, 0  ;;  %v2592_v45 = vld [vmem:[%s3504_s7 + $0x18] sm:$0xff]  ;;  %v2583_v46 = vld [vmem:[%s3501_s4 + $0xc] sm:$0xf] }
 0x64c   : > { %2784 = vmatpush3.bf16.msra.mxu0 %v1080_v47 }
 0x64d   : > { %2795 = vmatprep.subr.bf16.mxu0 %v3003_v2 }
 0x64f   : > { %2786 = vmatmul.mubr.msk.bf16.vlgmr.msra.gmra.mxu0 %vm451_vm2, %v2563_v49 }
 0x650   : > { %2796 = vmatpush3.bf16.msra.mxu0 %v1080_v47  ;;  %2797 = vmatprep.mubr.msk.bf16.mxu0 %vm3004_vm1, %v3003_v2 }
 0x651   : > { %2807 = vmatprep.subr.bf16.mxu0 %v3003_v2 }
 0x657   : > { %2798 = vmatmul.mubr.msk.bf16.vlgmr.msra.gmra.mxu0 %vm451_vm2, %v2567_v52 }
 0x658   : > { %2809 = vmatprep.mubr.msk.bf16.mxu0 %vm3004_vm1, %v3003_v2 }
 0x6bb   : > { %v1066_v48 = vpop.permute.xlu0 %1065 }
 0x6bc   : > { %v1067_v50 = vsel %vm441_vm3, %v1066_v48, %v3229_v43 }
 0x6bd   : > { %1068 = vrot.lane.b32.xlu1 %v1067_v50, %s3002_s14 }
 0x6c1   : > { %1333 = vperm.xlu1 %2948, %v2576_v51  }
 0x70f   : > { %v1116_v56 = vpop.f32.mrf.mxu0 }
 0x711   : > { %v2787_v57 = vpop.f32.mrf.mxu0 }
 0x712   : > { %v2582_v57 = vld [vmem:[%s3500_s3 + $0xc] sm:$0xf] }
 0x713   : > { %v1119_v58 = vpop.f32.mrf.mxu0 }
 0x715   : > { %v2788_v59 = vpop.f32.mrf.mxu0 }
 0x717   : > { %v1212_v0 = vpop.f32.mrf.mxu0 }
 0x719   : > { %v2799_v1 = vpop.f32.mrf.mxu0 }
 0x71b   : > { %v1215_v3 = vpop.f32.mrf.mxu0 }
 0x71d   : > { %v2800_v4 = vpop.f32.mrf.mxu0 }
 0x72f   : > { %v1069_v53 = vpop.permute.xlu1 %1068 }
 0x730   : > { %v1070_v54 = vsel %vm441_vm3, %v1069_v53, %v3229_v43 }
 0x731   : > { %v1071_v55 = vpack.c.bf16 %v1070_v54, %v1070_v54 }
 0x733   : > { %1123 = vrot.lane.b32.xlu0 %v1071_v55, %s3008_s28 }
 0x73c   : > { %v1334_v26 = vpop.permute.xlu1 %1333 }
 0x7a5   : > { %v1124_v60 = vpop.permute.xlu0 %1123 }
 0x7a6   : > { %v1129_v61 = vsel %vm455_vm0, %v1124_v60, 0 }
 0x7a7   : > { %2790 = vmatpush3.bf16.msra.mxu1 %v1129_v61 }
 0x7a8   : > { %2801 = vmatprep.subr.bf16.mxu1 %v3003_v2 }
 0x7aa   : > { %2792 = vmatmul.mubr.msk.bf16.vlgmr.msra.gmra.mxu1 %vm451_vm2, %v2562_v62 }
 0x7ab   : > { %2802 = vmatpush3.bf16.msra.mxu1 %v1129_v61  ;;  %2803 = vmatprep.mubr.msk.bf16.mxu1 %vm3004_vm1, %v3003_v2 }
 0x7ac   : > { %2813 = vmatprep.subr.bf16.mxu1 %v3003_v2 }
 0x7b2   : > { %2804 = vmatmul.mubr.msk.bf16.vlgmr.msra.gmra.mxu1 %vm451_vm2, %v2566_v63 }
 0x7b3   : > { %2815 = vmatprep.mubr.msk.bf16.mxu1 %vm3004_vm1, %v3003_v2 }
 0x86a   : > { %v1165_v5 = vpop.f32.mrf.mxu1 }
 0x86b   : > { %v1166_v15 = vadd.f32 %v1165_v5, %v1116_v56  ;;  %v2578_v56 = vld [vmem:[%s3498_s1 + $0xc] sm:$0xf] }
 0x86c   : > { %v2793_v6 = vpop.f32.mrf.mxu1 }
 0x86e   : > { %v1168_v7 = vpop.f32.mrf.mxu1 }
 0x870   : > { %v2794_v8 = vpop.f32.mrf.mxu1 }
 0x872   : > { %v1255_v9 = vpop.f32.mrf.mxu1 }
 0x873   : > { %v1256_v10 = vadd.f32 %v1255_v9, %v1212_v0 }
 0x874   : > { %v2805_v11 = vpop.f32.mrf.mxu1 }
 0x875   : > { %v2570_v12 = vmul.f32 -1.442695, %v1256_v10 }
 0x876   : > { %v1258_v13 = vpop.f32.mrf.mxu1 }
 0x877   : > { %2970 = vpow2.f32 %v2570_v12 }
 0x878   : > { %v2806_v14 = vpop.f32.mrf.mxu1  ;;  %2972 = vtanh.f32 %v1166_v15 }
 0x884   : > { %v2971_v16 = vpop.eup %2970 }
 0x885   : > { %v1265_v17 = vadd.f32 1.0, %v2971_v16  ;;  %v2973_v18 = vpop.eup %2972 }
 0x887   : > { %2974 = vrcp.f32 %v1265_v17  ;;  %v2953_v17 = vld [vmem:[%s3502_s5 + $0x18] sm:$0xff]  }
 0x894   : > { %v2975_v19 = vpop.eup %2974 }
 0x895   : > { %v1268_v20 = vmul.f32 %v2975_v19, %v2973_v18  ;;  %v2591_v18 = vld [vmem:[%s3503_s6 + $0xc] sm:$0xf] }
 0x897   : > { %v1269_v21 = vpack.c.bf16 %v1268_v20, %v1268_v20 }
 0x899   : > { %v1282_v22 = vsel %vm455_vm0, %v1269_v21, 0 }
 0x89a   : > { %2808 = vmatpush3.bf16.msra.mxu0 %v1282_v22  ;;  %2814 = vmatpush3.bf16.msra.mxu1 %v1282_v22 }
 0x89b   : > { %2819 = vmatprep.subr.bf16.mxu0 %v3003_v2  ;;  %2825 = vmatprep.subr.bf16.mxu1 %v3003_v2 }
 0x89d   : > { %2810 = vmatmul.mubr.msk.bf16.vlgmr.msra.gmra.mxu0 %vm451_vm2, %v2952_v23  ;;  %2816 = vmatmul.mubr.msk.bf16.vlgmr.msra.gmra.mxu1 %vm451_vm2, %v2575_v24 }
 0x89e   : > { %2821 = vmatprep.mubr.msk.bf16.mxu0 %vm3004_vm1, %v3003_v2  ;;  %2827 = vmatprep.mubr.msk.bf16.mxu1 %vm3004_vm1, %v3003_v2 }
 0x95d   : > { %v1318_v27 = vpop.f32.mrf.mxu0  ;;  %v1373_v28 = vpop.f32.mrf.mxu1 }
 0x95e   : > { %v3291_v29 = vadd.f32 %v1318_v27, %v1005_v25  ;;  %v1374_v30 = vadd.f32 %v1373_v28, %v1334_v26 }
 0x95f   : > { %v2811_v32 = vpop.f32.mrf.mxu0  ;;  %v2817_v34 = vpop.f32.mrf.mxu1 }
 0x960   : > { %v3296_v38 = vadd.f32 %v1374_v30, %v3229_v43 }
 0x961   : > { %v1321_v39 = vpop.f32.mrf.mxu0  ;;  %v1376_v40 = vpop.f32.mrf.mxu1 }
 0x962   : > { %v3298_v41 = vadd.f32 %v1321_v39, %v1008_v36  ;;  %1381 = vrot.lane.b32.xlu0 %v3296_v38, %s3002_s14  ;;  %v1380_v31 = vpack.c.bf16 %v3296_v38, %v3296_v38 }
 0x963   : > { %v2818_v35 = vpop.f32.mrf.mxu1  ;;  %v2812_v42 = vpop.f32.mrf.mxu0 }
 0x964   : > { %v1396_v44 = vsel %vm455_vm0, %v1380_v31, 0  ;;  %v2599_v31 = vld [vmem:[%s3501_s4 + $0x10] sm:$0xf] }
 0x965   : > { %2820 = vmatpush3.bf16.msra.mxu0 %v1396_v44 }
 0x966   : > { %2831 = vmatprep.subr.bf16.mxu0 %v3003_v2 }
 0x968   : > { %2822 = vmatmul.mubr.msk.bf16.vlgmr.msra.gmra.mxu0 %vm451_vm2, %v2579_v33 }
 0x969   : > { %2832 = vmatpush3.bf16.msra.mxu0 %v1396_v44  ;;  %2833 = vmatprep.mubr.msk.bf16.mxu0 %vm3004_vm1, %v3003_v2 }
 0x96a   : > { %2843 = vmatprep.subr.bf16.mxu0 %v3003_v2 }
 0x970   : > { %2834 = vmatmul.mubr.msk.bf16.vlgmr.msra.gmra.mxu0 %vm451_vm2, %v2583_v46 }
 0x971   : > { %2845 = vmatprep.mubr.msk.bf16.mxu0 %vm3004_vm1, %v3003_v2 }
 0x9d4   : > { %v1382_v37 = vpop.permute.xlu0 %1381 }
 0x9d5   : > { %v1383_v43 = vsel %vm441_vm3, %v1382_v37, %v3296_v38 }
 0x9d6   : > { %1384 = vrot.lane.b32.xlu1 %v1383_v43, %s3002_s14 }
 0x9da   : > { %1649 = vperm.xlu1 %2948, %v2592_v45  }
 0xa28   : > { %v1432_v50 = vpop.f32.mrf.mxu0 }
 0xa2a   : > { %v2823_v51 = vpop.f32.mrf.mxu0 }
 0xa2c   : > { %v1435_v52 = vpop.f32.mrf.mxu0 }
 0xa2e   : > { %v2824_v53 = vpop.f32.mrf.mxu0 }
 0xa30   : > { %v1528_v58 = vpop.f32.mrf.mxu0 }
 0xa32   : > { %v2835_v59 = vpop.f32.mrf.mxu0 }
 0xa34   : > { %v1531_v60 = vpop.f32.mrf.mxu0 }
 0xa36   : > { %v2836_v61 = vpop.f32.mrf.mxu0 }
 0xa48   : > { %v1385_v47 = vpop.permute.xlu1 %1384 }
 0xa49   : > { %v1386_v49 = vsel %vm441_vm3, %v1385_v47, %v3296_v38 }
 0xa4a   : > { %v1387_v48 = vpack.c.bf16 %v1386_v49, %v1386_v49  ;;  %v2594_v49 = vld [vmem:[%s3498_s1 + $0x10] sm:$0xf] }
 0xa4c   : > { %1439 = vrot.lane.b32.xlu0 %v1387_v48, %s3005_s19  ;;  %v2598_v48 = vld [vmem:[%s3500_s3 + $0x10] sm:$0xf] }
 0xa55   : > { %v1650_v19 = vpop.permute.xlu1 %1649 }
 0xabe   : > { %v1440_v54 = vpop.permute.xlu0 %1439 }
 0xabf   : > { %v1445_v55 = vsel %vm455_vm0, %v1440_v54, 0 }
 0xac0   : > { %2826 = vmatpush3.bf16.msra.mxu1 %v1445_v55 }
 0xac1   : > { %2837 = vmatprep.subr.bf16.mxu1 %v3003_v2 }
 0xac3   : > { %2828 = vmatmul.mubr.msk.bf16.vlgmr.msra.gmra.mxu1 %vm451_vm2, %v2578_v56 }
 0xac4   : > { %2838 = vmatpush3.bf16.msra.mxu1 %v1445_v55  ;;  %2839 = vmatprep.mubr.msk.bf16.mxu1 %vm3004_vm1, %v3003_v2 }
 0xac5   : > { %2849 = vmatprep.subr.bf16.mxu1 %v3003_v2 }
 0xacb   : > { %2840 = vmatmul.mubr.msk.bf16.vlgmr.msra.gmra.mxu1 %vm451_vm2, %v2582_v57 }
 0xacc   : > { %2851 = vmatprep.mubr.msk.bf16.mxu1 %vm3004_vm1, %v3003_v2 }
 0xb83   : > { %v1481_v62 = vpop.f32.mrf.mxu1 }
 0xb84   : > { %v1482_v9 = vadd.f32 %v1481_v62, %v1432_v50 }
 0xb85   : > { %v2829_v63 = vpop.f32.mrf.mxu1 }
 0xb87   : > { %v1484_v0 = vpop.f32.mrf.mxu1 }
 0xb89   : > { %v2830_v1 = vpop.f32.mrf.mxu1 }
 0xb8b   : > { %v1571_v3 = vpop.f32.mrf.mxu1 }
 0xb8c   : > { %v1572_v4 = vadd.f32 %v1571_v3, %v1528_v58 }
 0xb8d   : > { %v2841_v5 = vpop.f32.mrf.mxu1 }
 0xb8e   : > { %v2586_v6 = vmul.f32 -1.442695, %v1572_v4 }
 0xb8f   : > { %v1574_v7 = vpop.f32.mrf.mxu1 }
 0xb90   : > { %2976 = vpow2.f32 %v2586_v6 }
 0xb91   : > { %v2842_v8 = vpop.f32.mrf.mxu1  ;;  %2978 = vtanh.f32 %v1482_v9  ;;  %v2954_v9 = vld [vmem:[%s3502_s5 + $0x20] sm:$0xff]  }
 0xb9d   : > { %v2977_v10 = vpop.eup %2976 }
 0xb9e   : > { %v1581_v11 = vadd.f32 1.0, %v2977_v10  ;;  %v2979_v12 = vpop.eup %2978  ;;  %v2607_v10 = vld [vmem:[%s3503_s6 + $0x10] sm:$0xf] }
 0xba0   : > { %2980 = vrcp.f32 %v1581_v11 }
 0xbad   : > { %v2981_v13 = vpop.eup %2980 }
 0xbae   : > { %v1584_v14 = vmul.f32 %v2981_v13, %v2979_v12 }
 0xbb0   : > { %v1585_v15 = vpack.c.bf16 %v1584_v14, %v1584_v14 }
 0xbb2   : > { %v1598_v16 = vsel %vm455_vm0, %v1585_v15, 0 }
 0xbb3   : > { %2844 = vmatpush3.bf16.msra.mxu0 %v1598_v16  ;;  %2850 = vmatpush3.bf16.msra.mxu1 %v1598_v16 }
 0xbb4   : > { %2855 = vmatprep.subr.bf16.mxu0 %v3003_v2  ;;  %2861 = vmatprep.subr.bf16.mxu1 %v3003_v2 }
 0xbb6   : > { %2846 = vmatmul.mubr.msk.bf16.vlgmr.msra.gmra.mxu0 %vm451_vm2, %v2953_v17  ;;  %2852 = vmatmul.mubr.msk.bf16.vlgmr.msra.gmra.mxu1 %vm451_vm2, %v2591_v18 }
 0xbb7   : > { %2857 = vmatprep.mubr.msk.bf16.mxu0 %vm3004_vm1, %v3003_v2  ;;  %2863 = vmatprep.mubr.msk.bf16.mxu1 %vm3004_vm1, %v3003_v2 }
 0xc76   : > { %v1634_v20 = vpop.f32.mrf.mxu0  ;;  %v1689_v21 = vpop.f32.mrf.mxu1 }
 0xc77   : > { %v3359_v22 = vadd.f32 %v1634_v20, %v3291_v29  ;;  %v1690_v23 = vadd.f32 %v1689_v21, %v1650_v19 }
 0xc78   : > { %v2847_v24 = vpop.f32.mrf.mxu0  ;;  %v2853_v25 = vpop.f32.mrf.mxu1 }
 0xc79   : > { %v3362_v26 = vadd.f32 %v1690_v23, %v3296_v38  ;;  %v2595_v38 = vld [vmem:[%s3499_s2 + $0x10] sm:$0xf] }
 0xc7a   : > { %v1637_v27 = vpop.f32.mrf.mxu0  ;;  %v1692_v28 = vpop.f32.mrf.mxu1 }
 0xc7b   : > { %v3365_v30 = vadd.f32 %v1637_v27, %v3298_v41  ;;  %1697 = vrot.lane.b32.xlu0 %v3362_v26, %s3002_s14  ;;  %v1696_v32 = vpack.c.bf16 %v3362_v26, %v3362_v26  ;;  %v2608_v41 = vld [vmem:[%s3504_s7 + $0x20] sm:$0xff] }
 0xc7c   : > { %v2854_v34 = vpop.f32.mrf.mxu1  ;;  %v2848_v29 = vpop.f32.mrf.mxu0 }
 0xc7d   : > { %v1712_v36 = vsel %vm455_vm0, %v1696_v32, 0 }
 0xc7e   : > { %2856 = vmatpush3.bf16.msra.mxu0 %v1712_v36 }
 0xc7f   : > { %2867 = vmatprep.subr.bf16.mxu0 %v3003_v2 }
 0xc81   : > { %2858 = vmatmul.mubr.msk.bf16.vlgmr.msra.gmra.mxu0 %vm451_vm2, %v2595_v38 }
 0xc82   : > { %2868 = vmatpush3.bf16.msra.mxu0 %v1712_v36  ;;  %2869 = vmatprep.mubr.msk.bf16.mxu0 %vm3004_vm1, %v3003_v2 }
 0xc83   : > { %2879 = vmatprep.subr.bf16.mxu0 %v3003_v2 }
 0xc89   : > { %2870 = vmatmul.mubr.msk.bf16.vlgmr.msra.gmra.mxu0 %vm451_vm2, %v2599_v31 }
 0xc8a   : > { %2881 = vmatprep.mubr.msk.bf16.mxu0 %vm3004_vm1, %v3003_v2 }
 0xced   : > { %v1698_v39 = vpop.permute.xlu0 %1697 }
 0xcee   : > { %v1699_v40 = vsel %vm441_vm3, %v1698_v39, %v3362_v26 }
 0xcef   : > { %1700 = vrot.lane.b32.xlu1 %v1699_v40, %s3002_s14 }
 0xcf3   : > { %1965 = vperm.xlu1 %2948, %v2608_v41  }
 0xd41   : > { %v1748_v33 = vpop.f32.mrf.mxu0 }
 0xd43   : > { %v2859_v37 = vpop.f32.mrf.mxu0 }
 0xd45   : > { %v1751_v43 = vpop.f32.mrf.mxu0 }
 0xd47   : > { %v2860_v45 = vpop.f32.mrf.mxu0 }
 0xd49   : > { %v1844_v50 = vpop.f32.mrf.mxu0 }
 0xd4b   : > { %v2871_v51 = vpop.f32.mrf.mxu0 }
 0xd4d   : > { %v1847_v52 = vpop.f32.mrf.mxu0 }
 0xd4f   : > { %v2872_v53 = vpop.f32.mrf.mxu0 }
 0xd61   : > { %v1701_v35 = vpop.permute.xlu1 %1700 }
 0xd62   : > { %v1702_v42 = vsel %vm441_vm3, %v1701_v35, %v3362_v26  ;;  %v2610_v35 = vld [vmem:[%s3498_s1 + $0x14] sm:$0xf] }
 0xd63   : > { %v1703_v44 = vpack.c.bf16 %v1702_v42, %v1702_v42  ;;  %v2614_v42 = vld [vmem:[%s3500_s3 + $0x14] sm:$0xf] }
 0xd65   : > { %1755 = vrot.lane.b32.xlu0 %v1703_v44, %s3007_s21 }
 0xd6e   : > { %v1966_v11 = vpop.permute.xlu1 %1965 }
 0xdd7   : > { %v1756_v46 = vpop.permute.xlu0 %1755 }
 0xdd8   : > { %v1761_v47 = vsel %vm455_vm0, %v1756_v46, 0 }
 0xdd9   : > { %2862 = vmatpush3.bf16.msra.mxu1 %v1761_v47 }
 0xdda   : > { %2873 = vmatprep.subr.bf16.mxu1 %v3003_v2 }
 0xddc   : > { %2864 = vmatmul.mubr.msk.bf16.vlgmr.msra.gmra.mxu1 %vm451_vm2, %v2594_v49 }
 0xddd   : > { %2874 = vmatpush3.bf16.msra.mxu1 %v1761_v47  ;;  %2875 = vmatprep.mubr.msk.bf16.mxu1 %vm3004_vm1, %v3003_v2 }
 0xdde   : > { %2885 = vmatprep.subr.bf16.mxu1 %v3003_v2 }
 0xde4   : > { %2876 = vmatmul.mubr.msk.bf16.vlgmr.msra.gmra.mxu1 %vm451_vm2, %v2598_v48 }
 0xde5   : > { %2887 = vmatprep.mubr.msk.bf16.mxu1 %vm3004_vm1, %v3003_v2 }
 0xe9c   : > { %v1797_v54 = vpop.f32.mrf.mxu1 }
 0xe9d   : > { %v1798_v0 = vadd.f32 %v1797_v54, %v1748_v33 }
 0xe9e   : > { %v2865_v55 = vpop.f32.mrf.mxu1 }
 0xea0   : > { %v1800_v56 = vpop.f32.mrf.mxu1 }
 0xea2   : > { %v2866_v57 = vpop.f32.mrf.mxu1 }
 0xea4   : > { %v1887_v58 = vpop.f32.mrf.mxu1 }
 0xea5   : > { %v1888_v59 = vadd.f32 %v1887_v58, %v1844_v50 }
 0xea6   : > { %v2877_v60 = vpop.f32.mrf.mxu1 }
 0xea7   : > { %v2602_v61 = vmul.f32 -1.442695, %v1888_v59 }
 0xea8   : > { %v1890_v62 = vpop.f32.mrf.mxu1 }
 0xea9   : > { %2982 = vpow2.f32 %v2602_v61  ;;  %v2955_v62 = vld [vmem:[%s3502_s5 + $0x28] sm:$0xff]  }
 0xeaa   : > { %v2878_v63 = vpop.f32.mrf.mxu1  ;;  %2984 = vtanh.f32 %v1798_v0 }
 0xeb6   : > { %v2983_v1 = vpop.eup %2982 }
 0xeb7   : > { %v1897_v3 = vadd.f32 1.0, %v2983_v1  ;;  %v2985_v4 = vpop.eup %2984 }
 0xeb9   : > { %2986 = vrcp.f32 %v1897_v3 }
 0xec6   : > { %v2987_v5 = vpop.eup %2986 }
 0xec7   : > { %v1900_v6 = vmul.f32 %v2987_v5, %v2985_v4 }
 0xec9   : > { %v1901_v7 = vpack.c.bf16 %v1900_v6, %v1900_v6  ;;  %v2956_v6 = vld [vmem:[%s3506_s9] sm:$0xff]  }
 0xecb   : > { %v1914_v8 = vsel %vm455_vm0, %v1901_v7, 0  ;;  %v2623_v7 = vld [vmem:[%s3505_s8] ss:$0 sm:$0xff] }
 0xecc   : > { %2880 = vmatpush3.bf16.msra.mxu0 %v1914_v8  ;;  %2886 = vmatpush3.bf16.msra.mxu1 %v1914_v8 }
 0xecd   : > { %2891 = vmatprep.subr.bf16.mxu0 %v3003_v2  ;;  %2897 = vmatprep.subr.bf16.mxu1 %v3003_v2 }
 0xecf   : > { %2882 = vmatmul.mubr.msk.bf16.vlgmr.msra.gmra.mxu0 %vm451_vm2, %v2954_v9  ;;  %2888 = vmatmul.mubr.msk.bf16.vlgmr.msra.gmra.mxu1 %vm451_vm2, %v2607_v10 }
 0xed0   : > { %2893 = vmatprep.mubr.msk.bf16.mxu0 %vm3004_vm1, %v3003_v2  ;;  %2899 = vmatprep.mubr.msk.bf16.mxu1 %vm3004_vm1, %v3003_v2 }
 0xf8f   : > { %v1950_v12 = vpop.f32.mrf.mxu0  ;;  %v2005_v13 = vpop.f32.mrf.mxu1 }
 0xf90   : > { %v3426_v14 = vadd.f32 %v1950_v12, %v3359_v22  ;;  %v2006_v15 = vadd.f32 %v2005_v13, %v1966_v11  ;;  %v2611_v22 = vld [vmem:[%s3499_s2 + $0x14] sm:$0xf] }
 0xf91   : > { %v2883_v16 = vpop.f32.mrf.mxu0  ;;  %v2889_v17 = vpop.f32.mrf.mxu1 }
 0xf92   : > { %v2011_v18 = vadd.f32 %v2006_v15, %v3362_v26 }
 0xf93   : > { %v1953_v19 = vpop.f32.mrf.mxu0  ;;  %v2008_v20 = vpop.f32.mrf.mxu1 }
 0xf94   : > { %v3430_v21 = vadd.f32 %v1953_v19, %v3365_v30  ;;  %2013 = vrot.lane.b32.xlu0 %v2011_v18, %s3002_s14  ;;  %v2012_v23 = vpack.c.bf16 %v2011_v18, %v2011_v18  ;;  %v2615_v30 = vld [vmem:[%s3501_s4 + $0x14] sm:$0xf] }
 0xf95   : > { %v2890_v24 = vpop.f32.mrf.mxu1  ;;  %v2884_v25 = vpop.f32.mrf.mxu0 }
 0xf96   : > { %v2028_v27 = vsel %vm455_vm0, %v2012_v23, 0  ;;  %v2957_v23 = vld [vmem:[%s3508_s11] sm:$0xff]  }
 0xf97   : > { %2892 = vmatpush3.bf16.msra.mxu0 %v2028_v27 }
 0xf98   : > { %2903 = vmatprep.subr.bf16.mxu0 %v3003_v2 }
 0xf9a   : > { %2894 = vmatmul.mubr.msk.bf16.vlgmr.msra.gmra.mxu0 %vm451_vm2, %v2611_v22 }
 0xf9b   : > { %2904 = vmatpush3.bf16.msra.mxu0 %v2028_v27  ;;  %2905 = vmatprep.mubr.msk.bf16.mxu0 %vm3004_vm1, %v3003_v2  ;;  %v2624_v27 = vld [vmem:[%s3507_s10] ss:$0 sm:$0xff] }
 0xf9c   : > { %2915 = vmatprep.subr.bf16.mxu0 %v3003_v2 }
 0xfa2   : > { %2906 = vmatmul.mubr.msk.bf16.vlgmr.msra.gmra.mxu0 %vm451_vm2, %v2615_v30 }
 0xfa3   : > { %2917 = vmatprep.mubr.msk.bf16.mxu0 %vm3004_vm1, %v3003_v2 }
0x1006   : > { %v2014_v26 = vpop.permute.xlu0 %2013 }
0x1007   : > { %v2015_v28 = vsel %vm441_vm3, %v2014_v26, %v2011_v18 }
0x1008   : > { %2016 = vrot.lane.b32.xlu1 %v2015_v28, %s3002_s14 }
0x105a   : > { %v2064_v36 = vpop.f32.mrf.mxu0 }
0x105c   : > { %v2895_v38 = vpop.f32.mrf.mxu0 }
0x105e   : > { %v2067_v39 = vpop.f32.mrf.mxu0 }
0x1060   : > { %v2896_v40 = vpop.f32.mrf.mxu0 }
0x1062   : > { %v2160_v44 = vpop.f32.mrf.mxu0 }
0x1064   : > { %v2907_v33 = vpop.f32.mrf.mxu0 }
0x1066   : > { %v2163_v37 = vpop.f32.mrf.mxu0 }
0x1068   : > { %v2908_v43 = vpop.f32.mrf.mxu0 }
0x107a   : > { %v2017_v32 = vpop.permute.xlu1 %2016 }
0x107b   : > { %v2018_v34 = vsel %vm441_vm3, %v2017_v32, %v2011_v18 }
0x107c   : > { %v2019_v29 = vpack.c.bf16 %v2018_v34, %v2018_v34 }
0x107e   : > { %2071 = vrot.lane.b32.xlu0 %v2019_v29, %s3008_s28 }
0x10f0   : > { %v2072_v41 = vpop.permute.xlu0 %2071 }
0x10f1   : > { %v2077_v31 = vsel %vm455_vm0, %v2072_v41, 0 }
0x10f2   : > { %2898 = vmatpush3.bf16.msra.mxu1 %v2077_v31 }
0x10f3   : > { %2909 = vmatprep.subr.bf16.mxu1 %v3003_v2 }
0x10f5   : > { %2900 = vmatmul.mubr.msk.bf16.vlgmr.msra.gmra.mxu1 %vm451_vm2, %v2610_v35 }
0x10f6   : > { %2910 = vmatpush3.bf16.msra.mxu1 %v2077_v31  ;;  %2911 = vmatprep.mubr.msk.bf16.mxu1 %vm3004_vm1, %v3003_v2  ;;  %v2628_v31 = vld [vmem:[%s3509_s12] ss:$0 sm:$0xff] }
0x10f7   : > { %2921 = vmatprep.subr.bf16.mxu1 %v2956_v6 }
0x10fd   : > { %2912 = vmatmul.mubr.msk.bf16.vlgmr.msra.gmra.mxu1 %vm451_vm2, %v2614_v42 }
0x10fe   : > { %2922 = vmatpush3.bf16.msra.mxu1 %v2956_v6 }
0x11b5   : > { %v2113_v45 = vpop.f32.mrf.mxu1 }
0x11b6   : > { %v2114_v54 = vadd.f32 %v2113_v45, %v2064_v36 }
0x11b7   : > { %v2901_v46 = vpop.f32.mrf.mxu1 }
0x11b9   : > { %v2116_v47 = vpop.f32.mrf.mxu1 }
0x11bb   : > { %v2902_v49 = vpop.f32.mrf.mxu1 }
0x11bd   : > { %v2203_v48 = vpop.f32.mrf.mxu1 }
0x11be   : > { %v2204_v50 = vadd.f32 %v2203_v48, %v2160_v44 }
0x11bf   : > { %v2913_v51 = vpop.f32.mrf.mxu1 }
0x11c0   : > { %v2618_v52 = vmul.f32 -1.442695, %v2204_v50 }
0x11c1   : > { %v2206_v53 = vpop.f32.mrf.mxu1 }
0x11c2   : > { %2988 = vpow2.f32 %v2618_v52 }
0x11c3   : > { %v2914_v2 = vpop.f32.mrf.mxu1  ;;  %2990 = vtanh.f32 %v2114_v54 }
0x11cf   : > { %v2989_v55 = vpop.eup %2988 }
0x11d0   : > { %v2213_v56 = vadd.f32 1.0, %v2989_v55  ;;  %v2991_v57 = vpop.eup %2990 }
0x11d2   : > { %2992 = vrcp.f32 %v2213_v56 }
0x11df   : > { %v2993_v58 = vpop.eup %2992 }
0x11e0   : > { %v2216_v59 = vmul.f32 %v2993_v58, %v2991_v57 }
0x11e2   : > { %v2217_v60 = vpack.c.bf16 %v2216_v59, %v2216_v59 }
0x11e4   : > { %v2230_v61 = vsel %vm455_vm0, %v2217_v60, 0 }
0x11e5   : > { %2916 = vmatpush3.bf16.msra.mxu0 %v2230_v61 }
0x11e6   : > { %2927 = vmatprep.subr.bf16.mxu0 %v2957_v23 }
0x11e8   : > { %2918 = vmatmul.mubr.msk.bf16.vlgmr.msra.gmra.mxu0 %vm451_vm2, %v2955_v62 }
0x11e9   : > { %2928 = vmatpush3.bf16.msra.mxu0 %v2957_v23 }
0x12a8   : > { %v2266_v63 = vpop.f32.mrf.mxu0 }
0x12a9   : > { %v2273_v0 = vadd.f32 %v2266_v63, %v3426_v14 }
0x12aa   : > { %v2919_v1 = vpop.f32.mrf.mxu0 }
0x12ab   : > { %2275 = vxpose.xlu1.b32.start [1/2] (short) (narrow) %v2273_v0, 32 }
0x12ac   : > { %v2269_v3 = vpop.f32.mrf.mxu0 }
0x12ad   : > { %v2274_v4 = vadd.f32 %v2269_v3, %v3430_v21 }
0x12ae   : > { %v2920_v5 = vpop.f32.mrf.mxu0 }
0x12af   : > { %2276 = vxpose.xlu1.b32.end [2/2] (short) (narrow) %v2274_v4, 32 }
0x1327   : > { %v2291_v8 = vpop.trf.xlu1 }
0x1328   : > { %v2314_v9 = vadd.f32 %v2623_v7, %v2291_v8 }
0x132a   : > { %v2318_v12 = vmax.f32 %v2314_v9, 0.0 }
0x132b   : > { %v2292_v10 = vpop.trf.xlu1 }
0x132c   : > { %v2315_v11 = vadd.f32 %v2623_v7, %v2292_v10 }
0x132e   : > { %v2319_v13 = vmax.f32 %v2315_v11, 0.0 }
0x132f   : > { %v2293_v14 = vpop.trf.xlu1 }
0x1330   : > { %v2322_v15 = vpack.c.bf16 %v2319_v13, %v2318_v12  ;;  %v2316_v16 = vadd.f32 %v2623_v7, %v2293_v14 }
0x1332   : > { %2923 = vmatprep.mubr.msk.bf16.mxu1 %vm2339_vm4, %v2322_v15  ;;  %v2320_v19 = vmax.f32 %v2316_v16, 0.0 }
0x1333   : > { %v2294_v17 = vpop.trf.xlu1 }
0x1334   : > { %v2317_v18 = vadd.f32 %v2623_v7, %v2294_v17 }
0x1336   : > { %v2321_v20 = vmax.f32 %v2317_v18, 0.0 }
0x1338   : > { %v2323_v21 = vpack.c.bf16 %v2321_v20, %v2320_v19 }
0x133a   : > { %2924 = vmatmul.mubr.msk.bf16.vlgmr.msra.gmra.mxu1 %vm2339_vm4, %v2323_v21 }
0x13fa   : > { %v2925_v24 = vpop.f32.mrf.mxu1 }
0x13fb   : > { %v2389_v30 = vadd.f32 %v2925_v24, %v2624_v27 }
0x13fc   : > { %v2380_v25 = vpop.f32.mrf.mxu1 }
0x13fd   : > { %v2381_v26 = vadd.f32 %v2624_v27, %v2380_v25  ;;  %v2397_v39 = vmax.f32 %v2389_v30, 0.0 }
0x13fe   : > { %v2926_v22 = vpop.f32.mrf.mxu1 }
0x13ff   : > { %v2392_v28 = vadd.f32 %v2926_v22, %v2624_v27  ;;  %v2395_v36 = vmax.f32 %v2381_v26, 0.0 }
0x1400   : > { %v2383_v32 = vpop.f32.mrf.mxu1 }
0x1401   : > { %v2384_v34 = vadd.f32 %v2624_v27, %v2383_v32  ;;  %v2398_v29 = vmax.f32 %v2392_v28, 0.0 }
0x1403   : > { %v2396_v38 = vmax.f32 %v2384_v34, 0.0  ;;  %v2400_v41 = vpack.c.bf16 %v2398_v29, %v2397_v39 }
0x1405   : > { %v2399_v40 = vpack.c.bf16 %v2396_v38, %v2395_v36 }
0x1407   : > { %2929 = vmatprep.mubr.msk.bf16.mxu0 %vm2339_vm4, %v2399_v40 }
0x1408   : > { %2930 = vmatmul.mubr.msk.bf16.vlgmr.msra.gmra.mxu0 %vm2339_vm4, %v2400_v41 }
0x14c8   : > { %v2931_v35 = vpop.f32.mrf.mxu0 }
0x14c9   : > { %v2465_v42 = vadd.f32 %v2931_v35, %v2628_v31 }
0x14ca   : > { %v2456_v44 = vpop.f32.mrf.mxu0 }
0x14cb   : > { %2473 = vst [vmem:[%s437_s18 + $0x10] sm:$0xff] %v2465_v42  ;;  %v2457_v33 = vadd.f32 %v2628_v31, %v2456_v44 }
0x14cc   : > { %v2932_v37 = vpop.f32.mrf.mxu0 }
0x14cd   : > { %2471 = vst [vmem:[%s437_s18] sm:$0xff] %v2457_v33  ;;  %v2468_v43 = vadd.f32 %v2932_v37, %v2628_v31 }
0x14ce   : > { %v2459_v45 = vpop.f32.mrf.mxu0 }
0x14cf   : > { %2474 = vst [vmem:[%s437_s18 + $0x18] sm:$0xff] %v2468_v43  ;;  %v2460_v46 = vadd.f32 %v2628_v31, %v2459_v45 }
0x14d1   : > { %2472 = vst [vmem:[%s437_s18 + $0x8] sm:$0xff] %v2460_v46 }
0x14d2 PF: > { %s23_s25 = sadd.s32 1, %s3000_s25  }
0x14d3   : > { %p20_p4 = scmp.ge.s32.totalorder %s23_s25, 4  }
0x14d5   :  { %22 = sbr.rel (!%p20_p4) target bundleno = 1 (0x1), region = 135 }

</bundles_post_ra>
